<compile_context>
chip_gen: v6e
topology: v6e:2x2x1
jax: 0.10.0
libtpu: 0.0.40
codegen_flags: <defaults>
</compile_context>

<pallas_src>
import jax
import jax.numpy as jnp
from jax.experimental import pallas as pl
from jax.experimental.pallas import tpu as pltpu


def ergcn_kernel(feats_ref, adj_ref,
                 w1_ref, b1_ref,
                 w2_ref, b2_ref,
                 wfc_ref, bfc_ref,
                 out_ref):
    """One batch-block (Bblk batch elements) per grid step.

    feats_ref: (Bblk, N, D2)  concat(text_out, vit_fc(box_vit))
    adj_ref  : (Bblk, N, N)   dense adjacency
    out_ref  : (Bblk, 1, PPAD) logits, zero-padded to 128 lanes
    """
    feats = feats_ref[...]                                   # (Bb, N, D2) f32
    adj = adj_ref[...]                                       # (Bb, N, N)  f32
    Bb, N, D2 = feats.shape
    PPAD = wfc_ref.shape[1]

    # GraphConvolution denominator (shared by both layers):
    #   denom = sum(adj, dim=2, keepdim=True) + 1
    denom = jnp.sum(adj, axis=2, keepdims=True) + 1.0        # (Bb, N, 1)
    inv_denom = pl.reciprocal(denom, approx=True)            # EUP slot, ~free

    # bf16 MXU operands, f32 accumulation; elementwise math stays f32.
    adj_bf = adj.astype(jnp.bfloat16)
    w1 = w1_ref[...].astype(jnp.bfloat16)
    w2 = w2_ref[...].astype(jnp.bfloat16)
    feats2 = feats.reshape(Bb * N, D2)                       # layout no-op

    # --- gc1 + ReLU ---
    h1 = jnp.dot(feats2.astype(jnp.bfloat16), w1,
                 preferred_element_type=jnp.float32).reshape(Bb, N, D2)
    g1 = jnp.einsum('bij,bjd->bid', adj_bf, h1.astype(jnp.bfloat16),
                    preferred_element_type=jnp.float32) * inv_denom + b1_ref[...]
    x1 = jnp.maximum(g1, 0.0)

    # --- gc2 + ReLU ---
    h2 = jnp.dot(x1.reshape(Bb * N, D2).astype(jnp.bfloat16), w2,
                 preferred_element_type=jnp.float32).reshape(Bb, N, D2)
    g2 = jnp.einsum('bij,bjd->bid', adj_bf, h2.astype(jnp.bfloat16),
                    preferred_element_type=jnp.float32) * inv_denom + b2_ref[...]
    x2 = jnp.maximum(g2, 0.0)                                # (Bb, N, D2)

    # --- attention pooling (f32) ---
    # alpha_mat = feats @ x2^T is only ever summed over the feats axis, so
    # contract sum(feats, axis=1) with x2 directly (no (N,N) intermediate).
    feats_sum = jnp.sum(feats, axis=1, keepdims=True)        # (Bb, 1, D2)
    s = jnp.einsum('bod,bnd->bon', feats_sum, x2,
                   preferred_element_type=jnp.float32)       # (Bb, 1, N)
    s = s - jnp.max(s, axis=2, keepdims=True)
    e = jnp.exp(s)
    alpha = e * pl.reciprocal(jnp.sum(e, axis=2, keepdims=True), approx=True)

    # fc folded through the pooling: (alpha @ x2) @ Wfc == alpha @ (x2 @ Wfc).
    z = jnp.dot(x2.reshape(Bb * N, D2), wfc_ref[...],
                preferred_element_type=jnp.float32).reshape(Bb, N, PPAD)
    out_ref[...] = (jnp.einsum('bon,bnp->bop', alpha, z,
                               preferred_element_type=jnp.float32)
                    + bfc_ref[...])                          # (Bb, 1, PPAD)


def ergcn_forward(text_out, box_vit, adj, params, *, block_b=8):
    B, Nt, D2 = text_out.shape
    _, Nv, Dv = box_vit.shape
    N = Nt + Nv
    P = params["wfc"].shape[1]
    assert adj.shape == (B, N, N)

    # vit_fc hoisted into one XLA matmul over B*Nv rows (K=768), and the
    # feature concat done here too -> kernel never reads 768-wide features.
    vit_proj = jnp.einsum('bnd,de->bne', box_vit, params["wv"]) + params["bv"]
    feats = jnp.concatenate([text_out, vit_proj], axis=1)    # (B, N, D2)

    # Lane-dense output: pad polarities dim to a full 128-lane tile.
    PPAD = ((P + 127) // 128) * 128
    wfc_pad = jnp.pad(params["wfc"], ((0, 0), (0, PPAD - P)))
    bfc_pad = jnp.pad(params["bfc"], ((0, 0), (0, PPAD - P)))

    # Batch-block the grid (amortize ~0.35us/step); pad B to a multiple.
    Bblk = min(block_b, B)
    num_blocks = (B + Bblk - 1) // Bblk
    Bpad = num_blocks * Bblk
    if Bpad != B:
        feats = jnp.pad(feats, ((0, Bpad - B), (0, 0), (0, 0)))
        adj = jnp.pad(adj, ((0, Bpad - B), (0, 0), (0, 0)))

    def const2d(shape):
        # Grid-invariant weight/bias tiles (constant index map -> no re-DMA).
        return pl.BlockSpec(shape, lambda b: (0, 0))

    in_specs = [
        pl.BlockSpec((Bblk, N, D2), lambda b: (b, 0, 0)),    # feats
        pl.BlockSpec((Bblk, N, N), lambda b: (b, 0, 0)),     # adj
        const2d((D2, D2)), const2d((1, D2)),                 # gc1
        const2d((D2, D2)), const2d((1, D2)),                 # gc2
        const2d((D2, PPAD)), const2d((1, PPAD)),             # fc (padded)
    ]
    out_spec = pl.BlockSpec((Bblk, 1, PPAD), lambda b: (b, 0, 0))

    out = pl.pallas_call(
        ergcn_kernel,
        out_shape=jax.ShapeDtypeStruct((Bpad, 1, PPAD), jnp.float32),
        grid=(num_blocks,),
        in_specs=in_specs,
        out_specs=out_spec,
        compiler_params=pltpu.CompilerParams(
            dimension_semantics=("parallel",)),
    )(feats, adj,
      params["w1"], params["b1"],
      params["w2"], params["b2"],
      wfc_pad, bfc_pad)

    return out[:B, 0, :P]                                    # (B, P)


def ergcn_reference(text_out, box_vit, adj, params):
    """Pure-JAX (f32) reference mirroring the PyTorch forward."""
    vit_proj = box_vit @ params["wv"] + params["bv"]
    feats = jnp.concatenate([text_out, vit_proj], axis=1)    # (B, N, D2)
    denom = jnp.sum(adj, axis=2, keepdims=True) + 1.0

    x1 = jax.nn.relu(adj @ (feats @ params["w1"]) / denom + params["b1"])
    x2 = jax.nn.relu(adj @ (x1 @ params["w2"]) / denom + params["b2"])

    alpha_mat = feats @ jnp.swapaxes(x2, 1, 2)
    alpha = jax.nn.softmax(jnp.sum(alpha_mat, axis=1, keepdims=True), axis=2)
    pooled = jnp.squeeze(alpha @ x2, axis=1)
    return pooled @ params["wfc"] + params["bfc"]


if __name__ == "__main__":
    # Shapes consistent with the module: hidden_dim=32 -> 2H=64, bert/vit dim
    # 768, polarities_dim=3, 16 text tokens + 8 image boxes, batch 16
    # (=> 2 grid steps of 8, keeps both v7x TensorCores busy).
    B, Nt, Nv, H, P, Dv = 16, 16, 8, 32, 3, 768
    D2 = 2 * H
    N = Nt + Nv

    key = jax.random.PRNGKey(0)
    ks = jax.random.split(key, 12)

    text_out = jax.random.normal(ks[0], (B, Nt, D2), jnp.float32)
    box_vit = jax.random.normal(ks[1], (B, Nv, Dv), jnp.float32)
    adj = (jax.random.uniform(ks[2], (B, N, N)) > 0.7).astype(jnp.float32)

    def init(k, shape, scale):
        return scale * jax.random.normal(k, shape, jnp.float32)

    params = {
        "wv":  init(ks[3], (Dv, D2), 0.02),
        "bv":  init(ks[4], (1, D2), 0.02),
        "w1":  init(ks[5], (D2, D2), 0.05),
        "b1":  init(ks[6], (1, D2), 0.02),
        "w2":  init(ks[7], (D2, D2), 0.05),
        "b2":  init(ks[8], (1, D2), 0.02),
        "wfc": init(ks[9], (D2, P), 0.05),
        "bfc": init(ks[10], (1, P), 0.02),
    }

    out = ergcn_forward(text_out, box_vit, adj, params)
    jax.block_until_ready(out)

    ref = ergcn_reference(text_out, box_vit, adj, params)
    assert out.shape == (B, P)
    assert bool(jnp.all(jnp.isfinite(out)))
    # bf16 MXU operands (f32 accumulate) + approx reciprocals => slightly
    # looser tolerance than pure-f32.
    assert jnp.allclose(out, ref, rtol=2e-2, atol=2e-2), (out, ref)

    print("KERNEL_OK")
</pallas_src>

<mosaic_0001>
module attributes {stable_mosaic.version = 11 : i64} {
  func.func @ergcn_kernel(%arg0: i32, %arg1: memref<8x24x64xf32, #tpu.memory_space<vmem>>, %arg2: memref<8x24x24xf32, #tpu.memory_space<vmem>>, %arg3: memref<64x64xf32, #tpu.memory_space<vmem>>, %arg4: memref<1x64xf32, #tpu.memory_space<vmem>>, %arg5: memref<64x64xf32, #tpu.memory_space<vmem>>, %arg6: memref<1x64xf32, #tpu.memory_space<vmem>>, %arg7: memref<64x128xf32, #tpu.memory_space<vmem>>, %arg8: memref<1x128xf32, #tpu.memory_space<vmem>>, %arg9: memref<8x1x128xf32, #tpu.memory_space<vmem>>) attributes {dimension_semantics = [#tpu.dimension_semantics<parallel>], iteration_bounds = array<i64: 2>, scalar_prefetch = 0 : i64, scratch_operands = 0 : i64, tpu.core_type = #tpu.core_type<tc>, window_params = [{transform_indices = @transform_0, window_bounds = array<i64: 8, 24, 64>}, {transform_indices = @transform_1, window_bounds = array<i64: 8, 24, 24>}, {pipeline_mode = #tpu.pipeline_mode<synchronous>, transform_indices = @transform_2, window_bounds = array<i64: 64, 64>}, {pipeline_mode = #tpu.pipeline_mode<synchronous>, transform_indices = @transform_3, window_bounds = array<i64: 1, 64>}, {pipeline_mode = #tpu.pipeline_mode<synchronous>, transform_indices = @transform_4, window_bounds = array<i64: 64, 64>}, {pipeline_mode = #tpu.pipeline_mode<synchronous>, transform_indices = @transform_5, window_bounds = array<i64: 1, 64>}, {pipeline_mode = #tpu.pipeline_mode<synchronous>, transform_indices = @transform_6, window_bounds = array<i64: 64, 128>}, {pipeline_mode = #tpu.pipeline_mode<synchronous>, transform_indices = @transform_7, window_bounds = array<i64: 1, 128>}, {transform_indices = @transform_8, window_bounds = array<i64: 8, 1, 128>}]} {
    %c0 = arith.constant 0 : index
    %c0_0 = arith.constant 0 : index
    %c0_1 = arith.constant 0 : index
    %0 = vector.load %arg1[%c0, %c0_0, %c0_1] : memref<8x24x64xf32, #tpu.memory_space<vmem>>, vector<8x24x64xf32>
    %c0_2 = arith.constant 0 : index
    %c0_3 = arith.constant 0 : index
    %c0_4 = arith.constant 0 : index
    %1 = vector.load %arg2[%c0_2, %c0_3, %c0_4] : memref<8x24x24xf32, #tpu.memory_space<vmem>>, vector<8x24x24xf32>
    %cst = arith.constant dense<0.000000e+00> : vector<8x24xf32>
    %2 = vector.multi_reduction <add>, %1, %cst [2] : vector<8x24x24xf32> to vector<8x24xf32>
    %3 = vector.shape_cast %2 : vector<8x24xf32> to vector<8x24x1xf32>
    %cst_5 = arith.constant 1.000000e+00 : f32
    %4 = vector.broadcast %cst_5 : f32 to vector<8x24x1xf32>
    %5 = arith.addf %3, %4 : vector<8x24x1xf32>
    %6 = tpu.reciprocal %5 {approx = true} : vector<8x24x1xf32> -> vector<8x24x1xf32>
    %7 = arith.truncf %1 : vector<8x24x24xf32> to vector<8x24x24xbf16>
    %c0_6 = arith.constant 0 : index
    %c0_7 = arith.constant 0 : index
    %8 = vector.load %arg3[%c0_6, %c0_7] : memref<64x64xf32, #tpu.memory_space<vmem>>, vector<64x64xf32>
    %9 = arith.truncf %8 : vector<64x64xf32> to vector<64x64xbf16>
    %c0_8 = arith.constant 0 : index
    %c0_9 = arith.constant 0 : index
    %10 = vector.load %arg5[%c0_8, %c0_9] : memref<64x64xf32, #tpu.memory_space<vmem>>, vector<64x64xf32>
    %11 = arith.truncf %10 : vector<64x64xf32> to vector<64x64xbf16>
    %12 = vector.shape_cast %0 : vector<8x24x64xf32> to vector<192x64xf32>
    %13 = arith.truncf %12 : vector<192x64xf32> to vector<192x64xbf16>
    %cst_10 = arith.constant dense<0.000000e+00> : vector<192x64xf32>
    %14 = tpu.matmul %13, %9, %cst_10 {dimension_numbers = #tpu.dot_dimension_numbers<[1], [0], [0], [1], [0, 0, 1, 1], [], []>} : vector<192x64xbf16>, vector<64x64xbf16>, vector<192x64xf32> -> vector<192x64xf32>
    %15 = vector.shape_cast %14 : vector<192x64xf32> to vector<8x24x64xf32>
    %16 = arith.truncf %15 : vector<8x24x64xf32> to vector<8x24x64xbf16>
    "tpu.trace_start"() <{level = 10 : i32, message = "bij,bjd->bid"}> : () -> ()
    %cst_11 = arith.constant dense<0.000000e+00> : vector<8x24x64xf32>
    %17 = tpu.matmul %7, %16, %cst_11 {dimension_numbers = #tpu.dot_dimension_numbers<[2], [1], [1], [2], [0, 0, 0, 1, 1, 2], [0], [0]>} : vector<8x24x24xbf16>, vector<8x24x64xbf16>, vector<8x24x64xf32> -> vector<8x24x64xf32>
    "tpu.trace_stop"() : () -> ()
    %18 = vector.broadcast %6 : vector<8x24x1xf32> to vector<8x24x64xf32>
    %19 = arith.mulf %17, %18 : vector<8x24x64xf32>
    %c0_12 = arith.constant 0 : index
    %c0_13 = arith.constant 0 : index
    %20 = vector.load %arg4[%c0_12, %c0_13] : memref<1x64xf32, #tpu.memory_space<vmem>>, vector<1x64xf32>
    %21 = vector.shape_cast %20 : vector<1x64xf32> to vector<1x1x64xf32>
    %22 = vector.broadcast %21 : vector<1x1x64xf32> to vector<8x24x64xf32>
    %23 = arith.addf %19, %22 : vector<8x24x64xf32>
    %cst_14 = arith.constant 0.000000e+00 : f32
    %24 = vector.broadcast %cst_14 : f32 to vector<8x24x64xf32>
    %25 = arith.maximumf %23, %24 : vector<8x24x64xf32>
    %26 = vector.shape_cast %25 : vector<8x24x64xf32> to vector<192x64xf32>
    %27 = arith.truncf %26 : vector<192x64xf32> to vector<192x64xbf16>
    %cst_15 = arith.constant dense<0.000000e+00> : vector<192x64xf32>
    %28 = tpu.matmul %27, %11, %cst_15 {dimension_numbers = #tpu.dot_dimension_numbers<[1], [0], [0], [1], [0, 0, 1, 1], [], []>} : vector<192x64xbf16>, vector<64x64xbf16>, vector<192x64xf32> -> vector<192x64xf32>
    %29 = vector.shape_cast %28 : vector<192x64xf32> to vector<8x24x64xf32>
    %30 = arith.truncf %29 : vector<8x24x64xf32> to vector<8x24x64xbf16>
    "tpu.trace_start"() <{level = 10 : i32, message = "bij,bjd->bid"}> : () -> ()
    %cst_16 = arith.constant dense<0.000000e+00> : vector<8x24x64xf32>
    %31 = tpu.matmul %7, %30, %cst_16 {dimension_numbers = #tpu.dot_dimension_numbers<[2], [1], [1], [2], [0, 0, 0, 1, 1, 2], [0], [0]>} : vector<8x24x24xbf16>, vector<8x24x64xbf16>, vector<8x24x64xf32> -> vector<8x24x64xf32>
    "tpu.trace_stop"() : () -> ()
    %32 = vector.broadcast %6 : vector<8x24x1xf32> to vector<8x24x64xf32>
    %33 = arith.mulf %31, %32 : vector<8x24x64xf32>
    %c0_17 = arith.constant 0 : index
    %c0_18 = arith.constant 0 : index
    %34 = vector.load %arg6[%c0_17, %c0_18] : memref<1x64xf32, #tpu.memory_space<vmem>>, vector<1x64xf32>
    %35 = vector.shape_cast %34 : vector<1x64xf32> to vector<1x1x64xf32>
    %36 = vector.broadcast %35 : vector<1x1x64xf32> to vector<8x24x64xf32>
    %37 = arith.addf %33, %36 : vector<8x24x64xf32>
    %cst_19 = arith.constant 0.000000e+00 : f32
    %38 = vector.broadcast %cst_19 : f32 to vector<8x24x64xf32>
    %39 = arith.maximumf %37, %38 : vector<8x24x64xf32>
    %cst_20 = arith.constant dense<0.000000e+00> : vector<8x64xf32>
    %40 = vector.multi_reduction <add>, %0, %cst_20 [1] : vector<8x24x64xf32> to vector<8x64xf32>
    %41 = vector.shape_cast %40 : vector<8x64xf32> to vector<8x1x64xf32>
    "tpu.trace_start"() <{level = 10 : i32, message = "bod,bnd->bon"}> : () -> ()
    %cst_21 = arith.constant dense<0.000000e+00> : vector<8x1x24xf32>
    %42 = tpu.matmul %41, %39, %cst_21 {dimension_numbers = #tpu.dot_dimension_numbers<[2], [2], [1], [1], [0, 0, 0, 1, 1, 1], [0], [0]>} : vector<8x1x64xf32>, vector<8x24x64xf32>, vector<8x1x24xf32> -> vector<8x1x24xf32>
    "tpu.trace_stop"() : () -> ()
    %cst_22 = arith.constant dense<0xFF800000> : vector<8x1xf32>
    %43 = vector.multi_reduction <maximumf>, %42, %cst_22 [2] : vector<8x1x24xf32> to vector<8x1xf32>
    %44 = vector.shape_cast %43 : vector<8x1xf32> to vector<8x1x1xf32>
    %45 = vector.broadcast %44 : vector<8x1x1xf32> to vector<8x1x24xf32>
    %46 = arith.subf %42, %45 : vector<8x1x24xf32>
    %47 = math.exp %46 : vector<8x1x24xf32>
    %cst_23 = arith.constant dense<0.000000e+00> : vector<8x1xf32>
    %48 = vector.multi_reduction <add>, %47, %cst_23 [2] : vector<8x1x24xf32> to vector<8x1xf32>
    %49 = vector.shape_cast %48 : vector<8x1xf32> to vector<8x1x1xf32>
    %50 = tpu.reciprocal %49 {approx = true} : vector<8x1x1xf32> -> vector<8x1x1xf32>
    %51 = vector.broadcast %50 : vector<8x1x1xf32> to vector<8x1x24xf32>
    %52 = arith.mulf %47, %51 : vector<8x1x24xf32>
    %53 = vector.shape_cast %39 : vector<8x24x64xf32> to vector<192x64xf32>
    %c0_24 = arith.constant 0 : index
    %c0_25 = arith.constant 0 : index
    %54 = vector.load %arg7[%c0_24, %c0_25] : memref<64x128xf32, #tpu.memory_space<vmem>>, vector<64x128xf32>
    %cst_26 = arith.constant dense<0.000000e+00> : vector<192x128xf32>
    %55 = tpu.matmul %53, %54, %cst_26 {dimension_numbers = #tpu.dot_dimension_numbers<[1], [0], [0], [1], [0, 0, 1, 1], [], []>} : vector<192x64xf32>, vector<64x128xf32>, vector<192x128xf32> -> vector<192x128xf32>
    %56 = vector.shape_cast %55 : vector<192x128xf32> to vector<8x24x128xf32>
    "tpu.trace_start"() <{level = 10 : i32, message = "bon,bnp->bop"}> : () -> ()
    %cst_27 = arith.constant dense<0.000000e+00> : vector<8x1x128xf32>
    %57 = tpu.matmul %52, %56, %cst_27 {dimension_numbers = #tpu.dot_dimension_numbers<[2], [1], [1], [2], [0, 0, 0, 1, 1, 2], [0], [0]>} : vector<8x1x24xf32>, vector<8x24x128xf32>, vector<8x1x128xf32> -> vector<8x1x128xf32>
    "tpu.trace_stop"() : () -> ()
    %c0_28 = arith.constant 0 : index
    %c0_29 = arith.constant 0 : index
    %58 = vector.load %arg8[%c0_28, %c0_29] : memref<1x128xf32, #tpu.memory_space<vmem>>, vector<1x128xf32>
    %59 = vector.shape_cast %58 : vector<1x128xf32> to vector<1x1x128xf32>
    %60 = vector.broadcast %59 : vector<1x1x128xf32> to vector<8x1x128xf32>
    %61 = arith.addf %57, %60 : vector<8x1x128xf32>
    %c0_30 = arith.constant 0 : index
    %c0_31 = arith.constant 0 : index
    %c0_32 = arith.constant 0 : index
    %62 = vector.load %arg9[%c0_30, %c0_31, %c0_32] : memref<8x1x128xf32, #tpu.memory_space<vmem>>, vector<8x1x128xf32>
    tpu.vector_store %arg9[%c0_30, %c0_31, %c0_32], %61 {strides = array<i32>} : memref<8x1x128xf32, #tpu.memory_space<vmem>>, vector<8x1x128xf32>,
    return
  }
  func.func @transform_0(%arg0: i32) -> (i32, i32, i32) {
    %c0_i32 = arith.constant 0 : i32
    %c0_i32_0 = arith.constant 0 : i32
    %c0_i32_1 = arith.constant 0 : i32
    return %arg0, %c0_i32, %c0_i32_0 : i32, i32, i32
  }
  func.func @transform_1(%arg0: i32) -> (i32, i32, i32) {
    %c0_i32 = arith.constant 0 : i32
    %c0_i32_0 = arith.constant 0 : i32
    %c0_i32_1 = arith.constant 0 : i32
    return %arg0, %c0_i32, %c0_i32_0 : i32, i32, i32
  }
  func.func @transform_2(%arg0: i32) -> (i32, i32) {
    %c0_i32 = arith.constant 0 : i32
    %c0_i32_0 = arith.constant 0 : i32
    %c0_i32_1 = arith.constant 0 : i32
    return %c0_i32, %c0_i32_0 : i32, i32
  }
  func.func @transform_3(%arg0: i32) -> (i32, i32) {
    %c0_i32 = arith.constant 0 : i32
    %c0_i32_0 = arith.constant 0 : i32
    %c0_i32_1 = arith.constant 0 : i32
    return %c0_i32, %c0_i32_0 : i32, i32
  }
  func.func @transform_4(%arg0: i32) -> (i32, i32) {
    %c0_i32 = arith.constant 0 : i32
    %c0_i32_0 = arith.constant 0 : i32
    %c0_i32_1 = arith.constant 0 : i32
    return %c0_i32, %c0_i32_0 : i32, i32
  }
  func.func @transform_5(%arg0: i32) -> (i32, i32) {
    %c0_i32 = arith.constant 0 : i32
    %c0_i32_0 = arith.constant 0 : i32
    %c0_i32_1 = arith.constant 0 : i32
    return %c0_i32, %c0_i32_0 : i32, i32
  }
  func.func @transform_6(%arg0: i32) -> (i32, i32) {
    %c0_i32 = arith.constant 0 : i32
    %c0_i32_0 = arith.constant 0 : i32
    %c0_i32_1 = arith.constant 0 : i32
    return %c0_i32, %c0_i32_0 : i32, i32
  }
  func.func @transform_7(%arg0: i32) -> (i32, i32) {
    %c0_i32 = arith.constant 0 : i32
    %c0_i32_0 = arith.constant 0 : i32
    %c0_i32_1 = arith.constant 0 : i32
    return %c0_i32, %c0_i32_0 : i32, i32
  }
  func.func @transform_8(%arg0: i32) -> (i32, i32, i32) {
    %c0_i32 = arith.constant 0 : i32
    %c0_i32_0 = arith.constant 0 : i32
    %c0_i32_1 = arith.constant 0 : i32
    return %arg0, %c0_i32, %c0_i32_0 : i32, i32, i32
  }
}

</mosaic_0001>

<bundles_post_ra>
// kernel: tpu_custom_call.1
= control target key start
LH: loop header
LB: loop body
LE: loop exit
PB: predicated region body
PF: predicated region fallthrough
CT: control target
= control target key end

     0   :  { %s6087_s0 = inlined_call_operand.hbm [shape: f32[16,24,64], index: 0, kind: input, shape index: {}]   ;;  %s6088_s1 = inlined_call_operand.hbm [shape: f32[16,24,24], index: 1, kind: input, shape index: {}]   ;;  %s6089_s2 = inlined_call_operand.hbm [shape: f32[64,64], index: 2, kind: input, shape index: {}]   ;;  %s6090_s3 = inlined_call_operand.vmem [shape: f32[1,64], index: 3, kind: input, shape index: {}]   ;;  %s6091_s4 = inlined_call_operand.hbm [shape: f32[64,64], index: 4, kind: input, shape index: {}]   ;;  %s6092_s5 = inlined_call_operand.vmem [shape: f32[1,64], index: 5, kind: input, shape index: {}]   ;;  %s6093_s6 = inlined_call_operand.hbm [shape: f32[64,128], index: 6, kind: input, shape index: {}]   ;;  %s6094_s7 = inlined_call_operand.vmem [shape: f32[1,128], index: 7, kind: input, shape index: {}]   ;;  %s6095_s8 = inlined_call_operand.hbm [shape: f32[16,1,128], index: 8, kind: output, shape index: {}]  }
   0x1   :  { %6106 = sst [smem:[#allocation20_spill]] %s6087_s0 }
   0x2   :  { %6107 = sst [smem:[#allocation21_spill]] %s6089_s2 }
   0x3   :  { %6108 = sst [smem:[#allocation22_spill]] %s6091_s4 }
   0x4   :  { %6109 = sst [smem:[#allocation23_spill]] %s6093_s6 }
   0x5   :  { %13 = vsyncpa [#allocation3], 0 }
   0x6   :  { %15 = vsyncpa [#allocation3 + $0x1], 0 }
   0x7   :  { %16 = vsyncpa [#allocation6], 0 }
   0x8   :  { %18 = vsyncpa [#allocation6 + $0x1], 0 }
   0x9   :  { %19 = vsyncpa [#allocation9], 0 }
   0xa   :  { %20 = vsyncpa [#allocation4], 0 }
   0xb   :  { %22 = vsyncpa [#allocation4 + $0x1], 0  ;;  %s4972_s27 = smov 0   ;;  %s4974_s28 = smov 0  }
   0xc   :  { %s4976_s29 = smov 0   ;;  %s4978_s30 = smov 0  }
   0xd LB: > { %s4993_s9 = sadd.s32 4294967295, %s4913_s30   ;;  %s3789_s10 = sadd.s32 4294967294, %s4913_s30   ;;  %s4913_s30 = sphi %s4978_s30, %s6141_s30   ;;  %s4909_s29 = sphi %s4976_s29, %s6140_s29   ;;  %s4905_s28 = sphi %s4974_s28, %s6139_s28   ;;  %s4901_s27 = sphi %s4972_s27, %s6138_s27  }
   0xe   : > { %p48_p0 = scmp.ne.s32.totalorder %s4905_s28, %s4901_s27  ;;  %p6096_p1 = scmp.eq.s32.totalorder %s4993_s9, 0 }
   0xf   : > { %p224_p2 = scmp.eq.s32.totalorder %s4993_s9, 1  ;;  %p230_p3 = scmp.eq.s32.totalorder %s3789_s10, 1 }
  0x10   : > { %p5002_p4 = por %p6096_p1, %p48_p0  ;;  %p3790_p5 = scmp.ge.s32.totalorder %s4913_s30, 1 }
  0x11   : > { %p5007_p6 = por %p230_p3, %p48_p0  ;;  %p237_p7 = scmp.lt.s32.totalorder %s4913_s30, 3 }
  0x12   : > { %s6110_s11 = scalar_select %p5002_p4, 1, 0 }
  0x13   : > { %s6111_s12 = scalar_select %p5007_p6, 1, 0 }
  0x14   : > { %p5012_p8 = pnand %p3790_p5, %p237_p7  ;;  %s4915_s14 = smov [#allocation7]  }
  0x15   : > { %s249_s15 = sshll.u32 %s4915_s14, 4  ;;  %s4916_s17 = smov [#allocation8]   ;;  %s250_s15 = int_to_ptr.vmem [resolvable:$true] %s249_s15 }
  0x16   : > { %p4553_p9 = pneg %p5012_p8  ;;  %s265_s18 = sshll.u32 %s4916_s17, 4  ;;  %s266_s18 = int_to_ptr.vmem [resolvable:$true] %s265_s18 }
  0x17   : > { %s4917_s19 = smov [#allocation10]   ;;  %s4714_s21 = scalar_lea.vmem %s250_s15, 1024 }
  0x18   : > { %p5021_p11 = pnand %p4553_p9, %p6096_p1  ;;  %s281_s20 = sshll.u32 %s4917_s19, 4  ;;  %s282_s20 = int_to_ptr.vmem [resolvable:$true] %s281_s20 }
  0x19   : > { %p4715_p13 = scmp.ne.s32.totalorder %s250_s15, %s4714_s21  ;;  %p4722_p5 = scmp.lt.s32.totalorder %s250_s15, %s250_s15 }
  0x1a   : > { %p4705_p12 = pneg %p5021_p11  ;;  %p4723_p7 = scmp.lt.s32.totalorder %s4714_s21, %s4714_s21 }
  0x1c   : > { %p4717_p0 = pnand %p4715_p13, %p4705_p12  ;;  %p4724_p9 = por %p4723_p7, %p4722_p5 }
  0x1e   : > { %p4718_p3 = pneg %p4717_p0 }
  0x20   : > { %p4725_p10 = pnand %p4724_p9, %p4718_p3 }
  0x22   : > { %4728 = shalt.err (!%p4725_p10)
}
  0x23   : > { %s6097_s22 = smov 128   ;;  %s6099_s23 = smov 8  }
  0x24   : > { %s6114_s2 = sld [smem:[#allocation21_spill]]  ;;  %s4740_s26 = scalar_lea.vmem %s266_s18, 1024 }
  0x25   : > { %p4741_p13 = scmp.ne.s32.totalorder %s266_s18, %s4740_s26  ;;  %p4748_p3 = scmp.lt.s32.totalorder %s266_s18, %s266_s18 }
  0x26   : > { %p4749_p10 = scmp.lt.s32.totalorder %s4740_s26, %s4740_s26 }
  0x27   : > { %p4743_p0 = pnand %p4741_p13, %p4705_p12 }
  0x28   : > { %p4750_p7 = por %p4749_p10, %p4748_p3 }
  0x29   : > { %p4744_p5 = pneg %p4743_p0 }
  0x2a   : > { %4556 = dma.hbm_to_vmem [thread:$0]  (!%p5021_p11), %s6114_s2, 1024, %s250_s15, [#allocation6], %s6097_s22, %s6097_s22, %s6099_s23  }
  0x2b   : > { %p4751_p9 = pnand %p4750_p7, %p4744_p5 }
  0x2d   : > { %4754 = shalt.err (!%p4751_p9)
}
  0x2e   : > { %s6115_s4 = sld [smem:[#allocation22_spill]]  ;;  %s4766_s15 = scalar_lea.vmem %s282_s20, 1024 }
  0x2f   : > { %p4767_p1 = scmp.ne.s32.totalorder %s282_s20, %s4766_s15  ;;  %p4774_p3 = scmp.lt.s32.totalorder %s282_s20, %s282_s20 }
  0x30   : > { %p4775_p5 = scmp.lt.s32.totalorder %s4766_s15, %s4766_s15 }
  0x31   : > { %p4769_p13 = pnand %p4767_p1, %p4705_p12 }
  0x32   : > { %p4776_p10 = por %p4775_p5, %p4774_p3 }
  0x33   : > { %p4770_p0 = pneg %p4769_p13 }
  0x34   : > { %4559 = dma.hbm_to_vmem [thread:$0]  (!%p5021_p11), %s6115_s4, 1024, %s266_s18, [#allocation9], %s6097_s22, %s6097_s22, %s6099_s23  }
  0x35   : > { %p4777_p7 = pnand %p4776_p10, %p4770_p0 }
  0x37   : > { %4780 = shalt.err (!%p4777_p7)
}
  0x38   : > { %s6116_s6 = sld [smem:[#allocation23_spill]]  ;;  %s5061_s16 = sadd.s32 1, %s4913_s30  }
  0x39   : > { %s32_s18 = ssub.s32 %s4913_s30, %s5061_s16  ;;  %s35_s21 = sadd.s32 1, %s4909_s29 }
  0x3a   : > { %p33_p1 = scmp.eq.s32.totalorder %s32_s18, 0  ;;  %p42_p12 = scmp.ne.s32.totalorder %s4909_s29, %s4905_s28 }
  0x3b   : > { %p43_p9 = scmp.eq.s32.totalorder %s4913_s30, 0  ;;  %p4577_p13 = scmp.lt.s32.totalorder %s4913_s30, 2 }
  0x3c   : > { %s5071_s24 = scalar_select %p33_p1, %s4909_s29, %s35_s21  }
  0x3d   : > { %p44_p0 = por %p43_p9, %p42_p12  ;;  %p5075_p3 = por %p224_p2, %p42_p12 }
  0x3e   : > { %4562 = dma.hbm_to_vmem [thread:$0]  (!%p5021_p11), %s6116_s6, 1024, %s282_s20, [#allocation9], %s6097_s22, %s6097_s22, %s6099_s23  }
  0x3f   : > { %6117 = sst [smem:[#allocation17_spill]] %s5071_s24  ;;  %s298_s26 = sand.u32 1, %s4909_s29  }
  0x40   : > { %s6118_s25 = scalar_select %p5075_p3, 1, 0 }
  0x41   : > { %s6101_s20 = smul.u32 3072, %s4913_s30  ;;  %s6119_s0 = sld [smem:[#allocation20_spill]] }
  0x42   : > { %s5081_s10 = smul.u32 192, %s298_s26  ;;  %p5090_p11 = pnand %p4577_p13, %p44_p0 }
  0x43   : > { %s5098_s23 = scalar_lea.sflag [#allocation3], %s298_s26 }
  0x44   : > { %s302_s21 = scalar_lea.vmem [#allocation2], %s5081_s10  ;;  %p4783_p5 = pneg %p5090_p11 }
  0x45   : > { %s310_s22 = sshll.u32 %s302_s21, 4  ;;  %s5096_s22 = int_to_ptr.vmem [resolvable:$true] %s310_s22 }
  0x47   : > { %s5088_s17 = scalar_lea.hbm %s6119_s0, %s6101_s20  ;;  %s4786_s2 = scalar_lea.hbm %s6119_s0, 6144 }
  0x48   : > { %s4781_s14 = scalar_lea.hbm %s5088_s17, 3072  ;;  %p4787_p1 = scmp.lt.s32.totalorder %s5088_s17, %s6119_s0 }
  0x49   : > { %p4782_p2 = scmp.ne.s32.totalorder %s5088_s17, %s4781_s14  ;;  %p4788_p12 = scmp.lt.s32.totalorder %s4786_s2, %s4781_s14 }
  0x4b   : > { %p4784_p10 = pnand %p4783_p5, %p4782_p2  ;;  %p4789_p9 = por %p4788_p12, %p4787_p1 }
  0x4d   : > { %p4785_p7 = pneg %p4784_p10 }
  0x4f   : > { %p4790_p13 = pnand %p4789_p9, %p4785_p7 }
  0x51   : > { %4793 = shalt.err (!%p4790_p13)
}
  0x52   : > { %s4794_s26 = scalar_lea.vmem %s5096_s22, 3072  ;;  %s4920_s20 = smov [#allocation2]  }
  0x53   : > { %p4795_p0 = scmp.ne.s32.totalorder %s5096_s22, %s4794_s26  ;;  %s4799_s21 = sshll.u32 %s4920_s20, 4  ;;  %s4800_s21 = int_to_ptr.vmem [resolvable:$false] %s4799_s21 }
  0x54   : > { %s4801_s15 = scalar_lea.vmem %s4800_s21, 6144  ;;  %p4802_p6 = scmp.lt.s32.totalorder %s5096_s22, %s4800_s21 }
  0x55   : > { %p4797_p2 = pnand %p4795_p0, %p4783_p5  ;;  %p4803_p3 = scmp.lt.s32.totalorder %s4801_s15, %s4794_s26 }
  0x57   : > { %p4798_p10 = pneg %p4797_p2  ;;  %p4804_p4 = por %p4803_p3, %p4802_p6 }
  0x59   : > { %p4805_p1 = pnand %p4804_p4, %p4798_p10 }
  0x5b   : > { %4808 = shalt.err (!%p4805_p1)
}
  0x5c   : > { %s6121_s2 = smov 8   ;;  %s6122_s4 = smov 128  }
  0x5d   : > { %4566 = dma.hbm_to_vmem [thread:$0]  (!%p5090_p11), %s5088_s17, 3072, %s5096_s22, %s5098_s23, %s6122_s4, %s6122_s4, %s6121_s2  }
  0x5e   : > { %s6123_s18 = smul.u32 3072, %s4913_s30  ;;  %s324_s21 = scalar_lea.vmem [#allocation5], %s5081_s10 }
  0x5f   : > { %s332_s15 = sshll.u32 %s324_s21, 4  ;;  %s6124_s0 = sand.u32 1, %s4913_s30   ;;  %s5136_s15 = int_to_ptr.vmem [resolvable:$true] %s332_s15 }
  0x60   : > { %s5133_s26 = scalar_lea.hbm %s6088_s1, %s6123_s18  ;;  %s321_s6 = scalar_lea.sflag [#allocation6], %s6124_s0 }
  0x61   : > { %s4809_s24 = scalar_lea.hbm %s5133_s26, 3072  ;;  %s4814_s17 = scalar_lea.hbm %s6088_s1, 6144 }
  0x62   : > { %p4810_p4 = scmp.ne.s32.totalorder %s5133_s26, %s4809_s24  ;;  %p4815_p7 = scmp.lt.s32.totalorder %s5133_s26, %s6088_s1 }
  0x63   : > { %p4816_p12 = scmp.lt.s32.totalorder %s4814_s17, %s4809_s24 }
  0x64   : > { %p4812_p6 = pnand %p4810_p4, %p4783_p5 }
  0x65   : > { %p4817_p9 = por %p4816_p12, %p4815_p7 }
  0x66   : > { %p4813_p3 = pneg %p4812_p6 }
  0x68   : > { %p4818_p13 = pnand %p4817_p9, %p4813_p3 }
  0x6a   : > { %4821 = shalt.err (!%p4818_p13)
}
  0x6b   : > { %s4822_s0 = scalar_lea.vmem %s5136_s15, 3072  ;;  %s4921_s10 = smov [#allocation5]  }
  0x6c   : > { %p4823_p0 = scmp.ne.s32.totalorder %s5136_s15, %s4822_s0  ;;  %s4827_s20 = sshll.u32 %s4921_s10, 4  ;;  %s4828_s20 = int_to_ptr.vmem [resolvable:$false] %s4827_s20 }
  0x6d   : > { %s4829_s21 = scalar_lea.vmem %s4828_s20, 6144  ;;  %p4830_p1 = scmp.lt.s32.totalorder %s5136_s15, %s4828_s20 }
  0x6e   : > { %p4825_p2 = pnand %p4823_p0, %p4783_p5  ;;  %p4831_p4 = scmp.lt.s32.totalorder %s4829_s21, %s4822_s0 }
  0x70   : > { %p4826_p10 = pneg %p4825_p2  ;;  %p4832_p6 = por %p4831_p4, %p4830_p1 }
  0x72   : > { %p4833_p7 = pnand %p4832_p6, %p4826_p10 }
  0x74   : > { %4836 = shalt.err (!%p4833_p7)
}
  0x75   : > { %4569 = dma.hbm_to_vmem [thread:$0]  (!%p5090_p11), %s5133_s26, 3072, %s5136_s15, %s321_s6, %s6122_s4, %s6122_s4, %s6121_s2  }
  0x76   : > { %344 = sbr.rel (%p5012_p8) target bundleno = 1769 (0x6e9), region = 52 }
  0x7b   : > { %s5168_s24 = sand.u32 1, %s4905_s28   ;;  %p6125_p5 = scmp.ne.s32.totalorder %s6110_s11, 0 }
  0x7c   : > { %s4534_s22 = smul.u32 192, %s5168_s24  ;;  %s347_s23 = scalar_lea.sflag [#allocation3], %s5168_s24 }
  0x7e   : > { %s5172_s17 = scalar_lea.vmem [#allocation2], %s4534_s22 }
  0x7f   : > { %4880 = dma.done.wait (%p6125_p5), %s347_s23, 3072  }
  0x80   : > { %4882 = vsyncadd (%p6125_p5), %s347_s23, 4294964224  ;;  %s355_s6 = sand.u32 1, %s4993_s9   ;;  %s5179_s19 = scalar_lea.vmem [#allocation5], %s4534_s22 }
  0x81   : > { %s356_s13 = scalar_lea.sflag [#allocation6], %s355_s6 }
  0x82   : > { %4884 = dma.done.wait (%p6125_p5), %s356_s13, 3072  }
  0x83   : > { %4886 = vsyncadd (%p6125_p5), %s356_s13, 4294964224  ;;  %p6126_p8 = scmp.eq.s32.totalorder %s4993_s9, 0 }
  0x85   : > { %4888 = dma.done.wait (%p6126_p8), [#allocation6], 1024   ;;  %p6127_p11 = pmov %p6126_p8 }
  0x86   : > { %p6128_p3 = pmov %p6126_p8 }
  0x87   : > { %4890 = vsyncadd (%p6127_p11), [#allocation6], 4294966272 }
  0x88   : > { %4892 = dma.done.wait (%p6128_p3), [#allocation9], 2048   ;;  %p6129_p12 = pmov %p6128_p3 }
  0x89   : > { %v604_v0 = vld [vmem:[#allocation7 + $0x30] sm:$0xff]  ;;  %v605_v1 = vld [vmem:[#allocation7 + $0x38] sm:$0xff]  ;;  %v602_v2 = vld [vmem:[#allocation7 + $0x20] sm:$0xff]  ;;  %vm634_vm0 = vcmask 523264   ;;  %vm461_vm1 = vcmask 195584   ;;  %vm822_vm2 = vcmask 1043456  }
  0x8a   : > { %4894 = vsyncadd (%p6129_p12), [#allocation9], 4294965248  ;;  %v609_v3 = vpack.c.bf16 %v605_v1, %v604_v0  ;;  %v603_v4 = vld [vmem:[#allocation7 + $0x28] sm:$0xff]  ;;  %v600_v6 = vld [vmem:[#allocation7 + $0x10] sm:$0xff]  ;;  %vm4923_vm3 = vmmov 0   ;;  %vm2776_vm4 = vcmask 188416  }
  0x8b   : > { %v608_v5 = vpack.c.bf16 %v603_v4, %v602_v2  ;;  %v601_v7 = vld [vmem:[#allocation7 + $0x18] sm:$0xff]  ;;  %v413_v8 = vld [vmem:[%s5172_s17] sm:$0xff]  ;;  %v414_v9 = vld [vmem:[%s5172_s17 + $0x8] sm:$0xff]  ;;  %s3805_s15 = sshll.u32 %s5168_s24, 3  ;;  %s3933_s20 = sshll.u32 %s4993_s9, 7 }
  0x8c   : > { %4126 = vmatprep.subr.bf16.mxu0 %v609_v3  ;;  %v5196_v10 = vld [vmem:[%s5172_s17 + $0x10] sm:$0xff]  ;;  %v2032_v11 = vsel %vm634_vm0, %v413_v8, 0.0  ;;  %v622_v12 = vpack.c.bf16 %v414_v9, %v413_v8  ;;  %v2033_v13 = vsel %vm634_vm0, %v414_v9, 0.0  ;;  %v5203_v15 = vld [vmem:[%s5172_s17 + $0x18] sm:$0xff]  ;;  %v5206_v16 = vld [vmem:[%s5172_s17 + $0x20] sm:$0xff]  ;;  %v607_v17 = vpack.c.bf16 %v601_v7, %v600_v6  ;;  %s6027_s0 = scalar_lea.vmem [#allocation11], %s3805_s15  ;;  %s6043_s23 = scalar_lea.hbm %s6095_s8, %s3933_s20 }
  0x8d   : > { %4127 = vmatpush3.bf16.msra.mxu0 %v609_v3  ;;  %v2035_v14 = vsel %vm634_vm0, %v5196_v10, 0.0  ;;  %v598_v18 = vld [vmem:[#allocation7] sm:$0xff]  ;;  %v2034_v19 = vadd.f32 %v2033_v13, %v2032_v11  ;;  %v2043_v20 = vsel %vm634_vm0, %v5203_v15, 0.0  ;;  %v418_v21 = vld [vmem:[%s5172_s17 + $0x28] sm:$0xff]  ;;  %v2044_v22 = vsel %vm634_vm0, %v5206_v16, 0.0  ;;  %v5214_v23 = vld [vmem:[%s5172_s17 + $0x30] sm:$0xff] }
  0x8e   : > { %4128 = vmatprep.subr.bf16.mxu0 %v608_v5  ;;  %v599_v24 = vld [vmem:[#allocation7 + $0x8] sm:$0xff]  ;;  %4134 = vmatprep.mubr.msk.bf16.mxu0 %vm634_vm0, %v622_v12  ;;  %v2045_v25 = vadd.f32 %v2044_v22, %v2043_v20  ;;  %v2046_v26 = vsel %vm634_vm0, %v418_v21, 0.0  ;;  %v420_v27 = vld [vmem:[%s5172_s17 + $0x38] sm:$0xff]  ;;  %v2054_v28 = vsel %vm634_vm0, %v5214_v23, 0.0  ;;  %v421_v29 = vld [vmem:[%s5172_s17 + $0x40] sm:$0xff]  ;;  %v623_v58 = vpack.c.bf16 %v5203_v15, %v5196_v10  ;;  %s3665_s10 = sshll.u32 %s6027_s0, 4  ;;  %s6038_s10 = int_to_ptr.vmem [resolvable:$true] %s3665_s10 }
  0x8f   : > { %v5222_v30 = vadd.f32 %v2035_v14, %v2034_v19  ;;  %v2055_v31 = vsel %vm634_vm0, %v420_v27, 0.0  ;;  %v422_v32 = vld [vmem:[%s5172_s17 + $0x48] sm:$0xff]  ;;  %v2057_v33 = vsel %vm634_vm0, %v421_v29, 0.0  ;;  %v423_v37 = vld [vmem:[%s5172_s17 + $0x50] sm:$0xff]  ;;  %v424_v38 = vld [vmem:[%s5172_s17 + $0x58] sm:$0xff]  ;;  %v606_v39 = vpack.c.bf16 %v599_v24, %v598_v18  ;;  %s4837_s6 = scalar_lea.vmem %s6038_s10, 128 }
  0x90   : > { %v5227_v34 = vadd.f32 %v2046_v26, %v2045_v25  ;;  %v2056_v35 = vadd.f32 %v2055_v31, %v2054_v28  ;;  %v2065_v36 = vsel %vm634_vm0, %v422_v32, 0.0  ;;  %v2066_v40 = vsel %vm634_vm0, %v423_v37, 0.0  ;;  %v425_v42 = vld [vmem:[%s5172_s17 + $0x60] sm:$0xff]  ;;  %v426_v45 = vld [vmem:[%s5172_s17 + $0x68] sm:$0xff]  ;;  %v427_v47 = vld [vmem:[%s5172_s17 + $0x70] sm:$0xff]  ;;  %p4838_p9 = scmp.ne.s32.totalorder %s6038_s10, %s4837_s6  ;;  %p6134_p13 = scmp.ne.s32.totalorder %s6118_s25, 0 }
  0x91   : > { %4129 = vmatpush3.bf16.msra.mxu0 %v608_v5  ;;  %v2068_v41 = vsel %vm634_vm0, %v424_v38, 0.0  ;;  %v2067_v44 = vadd.f32 %v2066_v40, %v2065_v36  ;;  %v2076_v46 = vsel %vm634_vm0, %v425_v42, 0.0  ;;  %v2077_v48 = vsel %vm634_vm0, %v426_v45, 0.0  ;;  %v428_v52 = vld [vmem:[%s5172_s17 + $0x78] sm:$0xff]  ;;  %v429_v53 = vld [vmem:[%s5172_s17 + $0x80] sm:$0xff]  ;;  %v430_v57 = vld [vmem:[%s5172_s17 + $0x88] sm:$0xff] }
  0x92   : > { %4130 = vmatprep.subr.bf16.mxu0 %v607_v17  ;;  %v5235_v43 = vadd.f32 %v2057_v33, %v2056_v35  ;;  %v2079_v49 = vsel %vm634_vm0, %v427_v47, 0.0  ;;  %v2078_v51 = vadd.f32 %v2077_v48, %v2076_v46  ;;  %v2087_v54 = vsel %vm634_vm0, %v428_v52, 0.0  ;;  %v431_v61 = vld [vmem:[%s5172_s17 + $0x90] sm:$0xff]  ;;  %v432_v63 = vld [vmem:[%s5172_s17 + $0x98] sm:$0xff]  ;;  %v433_v3 = vld [vmem:[%s5172_s17 + $0xa0] sm:$0xff]  ;;  %p4839_p0 = pnand %p4838_p9, %p6134_p13  ;;  %s4924_s9 = smov [#allocation11]  }
  0x93   : > { %v5242_v50 = vadd.f32 %v2068_v41, %v2067_v44  ;;  %v2088_v55 = vsel %vm634_vm0, %v429_v53, 0.0  ;;  %v2090_v60 = vsel %vm634_vm0, %v430_v57, 0.0  ;;  %v624_v62 = vpack.c.bf16 %v418_v21, %v5206_v16  ;;  %v434_v5 = vld [vmem:[%s5172_s17 + $0xa8] sm:$0xff]  ;;  %v435_v7 = vld [vmem:[%s5172_s17 + $0xb0] sm:$0xff]  ;;  %v436_v9 = vld [vmem:[%s5172_s17 + $0xb8] sm:$0xff]  ;;  %s3652_s17 = scalar_lea.sflag [#allocation4], %s5168_s24 }
  0x94   : > { %v5248_v56 = vadd.f32 %v2079_v49, %v2078_v51  ;;  %v2089_v59 = vadd.f32 %v2088_v55, %v2087_v54  ;;  %v2098_v0 = vsel %vm634_vm0, %v431_v61, 0.0  ;;  %v2099_v2 = vsel %vm634_vm0, %v432_v63, 0.0  ;;  %v437_v24 = vld [vmem:[%s5179_s19] sm:$0xff]  ;;  %v438_v25 = vld [vmem:[%s5179_s19 + $0x8] sm:$0xff]  ;;  %v443_v31 = vld [vmem:[%s5179_s19 + $0x30] sm:$0xff]  ;;  %p4840_p2 = pneg %p4839_p0  ;;  %s4841_s13 = sshll.u32 %s4924_s9, 4  ;;  %s4842_s13 = int_to_ptr.vmem [resolvable:$false] %s4841_s13 }
  0x95   : > { %4131 = vmatpush3.bf16.msra.mxu0 %v607_v17  ;;  %v2100_v4 = vadd.f32 %v2099_v2, %v2098_v0  ;;  %v2101_v6 = vsel %vm634_vm0, %v433_v3, 0.0  ;;  %v2109_v8 = vsel %vm634_vm0, %v434_v5, 0.0  ;;  %v2110_v10 = vsel %vm634_vm0, %v435_v7, 0.0  ;;  %v441_v28 = vld [vmem:[%s5179_s19 + $0x20] sm:$0xff]  ;;  %v446_v35 = vld [vmem:[%s5179_s19 + $0x48] sm:$0xff]  ;;  %v447_v36 = vld [vmem:[%s5179_s19 + $0x50] sm:$0xff]  ;;  %p4844_p10 = scmp.lt.s32.totalorder %s6038_s10, %s4842_s13 }
  0x96   : > { %4132 = vmatprep.subr.bf16.mxu0 %v606_v39  ;;  %v5258_v1 = vadd.f32 %v2090_v60, %v2089_v59  ;;  %v2111_v12 = vadd.f32 %v2110_v10, %v2109_v8  ;;  %v2112_v13 = vsel %vm634_vm0, %v436_v9, 0.0  ;;  %v625_v15 = vpack.c.bf16 %v420_v27, %v5214_v23  ;;  %v440_v27 = vld [vmem:[%s5179_s19 + $0x18] sm:$0xff]  ;;  %v453_v44 = vld [vmem:[%s5179_s19 + $0x80] sm:$0xff]  ;;  %v455_v51 = vld [vmem:[%s5179_s19 + $0x90] sm:$0xff] }
  0x97   : > { %v5270_v11 = vadd.f32 %v2101_v6, %v2100_v4  ;;  %v626_v16 = vpack.c.bf16 %v422_v32, %v421_v29  ;;  %v627_v17 = vpack.c.bf16 %v424_v38, %v423_v37  ;;  %v628_v18 = vpack.c.bf16 %v426_v45, %v425_v42  ;;  %v444_v32 = vld [vmem:[%s5179_s19 + $0x38] sm:$0xff]  ;;  %v449_v38 = vld [vmem:[%s5179_s19 + $0x60] sm:$0xff]  ;;  %v5309_v45 = vld [vmem:[%s5179_s19 + $0x10] sm:$0xff] }
  0x98   : > { %v5273_v14 = vadd.f32 %v2112_v13, %v2111_v12  ;;  %v629_v19 = vpack.c.bf16 %v428_v52, %v427_v47  ;;  %v630_v20 = vpack.c.bf16 %v430_v57, %v429_v53  ;;  %v631_v21 = vpack.c.bf16 %v432_v63, %v431_v61  ;;  %v452_v42 = vld [vmem:[%s5179_s19 + $0x78] sm:$0xff]  ;;  %v5320_v53 = vld [vmem:[%s5179_s19 + $0x28] sm:$0xff]  ;;  %v5329_v59 = vld [vmem:[%s5179_s19 + $0x40] sm:$0xff] }
  0x99   : > { %4133 = vmatpush3.bf16.msra.mxu0 %v606_v39  ;;  %v632_v22 = vpack.c.bf16 %v434_v5, %v433_v3  ;;  %v633_v23 = vpack.c.bf16 %v436_v9, %v435_v7  ;;  %v582_v26 = vpack.c.bf16 %v438_v25, %v437_v24  ;;  %v5291_v29 = vpack.c.bf16 %v441_v28, %v440_v27  ;;  %v450_v39 = vld [vmem:[%s5179_s19 + $0x68] sm:$0xff]  ;;  %v456_v52 = vld [vmem:[%s5179_s19 + $0x98] sm:$0xff]  ;;  %v459_v61 = vld [vmem:[%s5179_s19 + $0xb0] sm:$0xff] }
  0x9a   : > { %v5295_v33 = vpack.c.bf16 %v444_v32, %v443_v31  ;;  %v5299_v37 = vpack.c.bf16 %v447_v36, %v446_v35  ;;  %v5303_v40 = vpack.c.bf16 %v450_v39, %v449_v38  ;;  %v462_v41 = vsel %vm461_vm1, %v437_v24, 0.0  ;;  %v458_v60 = vld [vmem:[%s5179_s19 + $0xa8] sm:$0xff]  ;;  %v5341_v4 = vld [vmem:[%s5179_s19 + $0x58] sm:$0xff]  ;;  %v5347_v7 = vld [vmem:[%s5179_s19 + $0x70] sm:$0xff] }
  0x9b   : > { %4162 = vmatprep.mubr.msk.bf16.mxu1 %vm461_vm1, %v582_v26  ;;  %463 = vadd.xlane.f32.xlu0 %v462_v41  ;;  %v5311_v46 = vpack.c.bf16 %v453_v44, %v452_v42  ;;  %v468_v47 = vsel %vm461_vm1, %v5309_v45, 0.0  ;;  %v465_v48 = vsel %vm461_vm1, %v438_v25, 0.0  ;;  %v471_v49 = vsel %vm461_vm1, %v440_v27, 0.0  ;;  %v5355_v13 = vld [vmem:[%s5179_s19 + $0x88] sm:$0xff] }
  0x9c   : > { %4135 = vmatmul.mubr.msk.bf16.vlgmr.msra.gmra.mxu0 %vm634_vm0, %v623_v58  ;;  %469 = vadd.xlane.f32.xlu1 %v468_v47  ;;  %v5322_v54 = vpack.c.bf16 %v456_v52, %v455_v51  ;;  %v477_v55 = vsel %vm461_vm1, %v5320_v53, 0.0  ;;  %v474_v57 = vsel %vm461_vm1, %v441_v28, 0.0  ;;  %v480_v58 = vsel %vm461_vm1, %v443_v31, 0.0 }
  0x9d   : > { %4138 = vmatprep.mubr.msk.bf16.mxu0 %vm634_vm0, %v624_v62  ;;  %v483_v62 = vsel %vm461_vm1, %v444_v32, 0.0  ;;  %v486_v63 = vsel %vm461_vm1, %v5329_v59, 0.0  ;;  %v5336_v0 = vpack.c.bf16 %v459_v61, %v458_v60  ;;  %v489_v2 = vsel %vm461_vm1, %v446_v35, 0.0 }
  0x9e   : > { %v492_v3 = vsel %vm461_vm1, %v447_v36, 0.0  ;;  %v495_v5 = vsel %vm461_vm1, %v5341_v4, 0.0  ;;  %v498_v6 = vsel %vm461_vm1, %v449_v38, 0.0  ;;  %v501_v8 = vsel %vm461_vm1, %v450_v39, 0.0 }
  0x9f   : > { %466 = vadd.xlane.f32.xlu0 %v465_v48  ;;  %v504_v9 = vsel %vm461_vm1, %v5347_v7, 0.0  ;;  %v507_v10 = vsel %vm461_vm1, %v452_v42, 0.0  ;;  %v510_v12 = vsel %vm461_vm1, %v453_v44, 0.0  ;;  %v5377_v36 = vpack.c.bf16 %v5309_v45, %v5309_v45 }
  0xa0   : > { %472 = vadd.xlane.f32.xlu1 %v471_v49 }
  0xa3   : > { %475 = vadd.xlane.f32.xlu0 %v474_v57 }
  0xa4   : > { %4139 = vmatmul.mubr.msk.bf16.gmra.mxu0 %vm634_vm0, %v625_v15  ;;  %478 = vadd.xlane.f32.xlu1 %v477_v55  ;;  %v513_v15 = vsel %vm461_vm1, %v5355_v13, 0.0 }
  0xa5   : > { %4142 = vmatprep.mubr.msk.bf16.mxu0 %vm634_vm0, %v626_v16  ;;  %v516_v16 = vsel %vm461_vm1, %v455_v51, 0.0 }
  0xa7   : > { %481 = vadd.xlane.f32.xlu0 %v480_v58 }
  0xa8   : > { %484 = vadd.xlane.f32.xlu1 %v483_v62 }
  0xab   : > { %487 = vadd.xlane.f32.xlu0 %v486_v63  ;;  %v5397_v63 = vpack.c.bf16 %v5329_v59, %v5329_v59  ;;  %v5407_v59 = vpack.c.bf16 %v5341_v4, %v5341_v4  ;;  %v5417_v4 = vpack.c.bf16 %v5347_v7, %v5347_v7  ;;  %v5427_v7 = vpack.c.bf16 %v5355_v13, %v5355_v13 }
  0xac   : > { %4143 = vmatmul.mubr.msk.bf16.gmra.mxu0 %vm634_vm0, %v627_v17  ;;  %490 = vadd.xlane.f32.xlu1 %v489_v2  ;;  %v5361_v17 = vld [vmem:[%s5179_s19 + $0xa0] sm:$0xff] }
  0xad   : > { %4146 = vmatprep.mubr.msk.bf16.mxu0 %vm634_vm0, %v628_v18  ;;  %v519_v18 = vsel %vm461_vm1, %v456_v52, 0.0  ;;  %v5387_v52 = vpack.c.bf16 %v5320_v53, %v5320_v53  ;;  %v5437_v13 = vpack.c.bf16 %v5361_v17, %v5361_v17 }
  0xaf   : > { %493 = vadd.xlane.f32.xlu0 %v492_v3 }
  0xb0   : > { %496 = vadd.xlane.f32.xlu1 %v495_v5 }
  0xb3   : > { %499 = vadd.xlane.f32.xlu0 %v498_v6 }
  0xb4   : > { %4147 = vmatmul.mubr.msk.bf16.gmra.mxu0 %vm634_vm0, %v629_v19  ;;  %502 = vadd.xlane.f32.xlu1 %v501_v8  ;;  %v522_v19 = vsel %vm461_vm1, %v5361_v17, 0.0  ;;  %v616_v17 = vld [vmem:[#allocation8 + $0x30] sm:$0xff] }
  0xb5   : > { %4150 = vmatprep.mubr.msk.bf16.mxu0 %vm634_vm0, %v630_v20  ;;  %v525_v20 = vsel %vm461_vm1, %v458_v60, 0.0 }
  0xb7   : > { %505 = vadd.xlane.f32.xlu0 %v504_v9 }
  0xb8   : > { %508 = vadd.xlane.f32.xlu1 %v507_v10 }
  0xbb   : > { %511 = vadd.xlane.f32.xlu0 %v510_v12 }
  0xbc   : > { %4151 = vmatmul.mubr.msk.bf16.gmra.mxu0 %vm634_vm0, %v631_v21  ;;  %514 = vadd.xlane.f32.xlu1 %v513_v15  ;;  %v528_v21 = vsel %vm461_vm1, %v459_v61, 0.0 }
  0xbd   : > { %4154 = vmatprep.mubr.msk.bf16.mxu0 %vm634_vm0, %v632_v22  ;;  %v5369_v22 = vld [vmem:[%s5179_s19 + $0xb8] sm:$0xff]  ;;  %s4843_s19 = scalar_lea.vmem %s4842_s13, 256 }
  0xbe   : > { %p4845_p1 = scmp.lt.s32.totalorder %s4843_s19, %s4837_s6 }
  0xbf   : > { %517 = vadd.xlane.f32.xlu0 %v516_v16 }
  0xc0   : > { %520 = vadd.xlane.f32.xlu1 %v519_v18  ;;  %p4846_p4 = por %p4845_p1, %p4844_p10 }
  0xc2   : > { %p4847_p6 = pnand %p4846_p4, %p4840_p2 }
  0xc3   : > { %523 = vadd.xlane.f32.xlu0 %v522_v19 }
  0xc4   : > { %4155 = vmatmul.mubr.msk.bf16.gmra.mxu0 %vm634_vm0, %v633_v23  ;;  %526 = vadd.xlane.f32.xlu1 %v525_v20  ;;  %v531_v23 = vsel %vm461_vm1, %v5369_v22, 0.0 }
  0xc5   : > { %4258 = vmatprep.mubr.msk.bf16.mxu0 %vm461_vm1, %v582_v26 }
  0xc7   : > { %529 = vadd.xlane.f32.xlu0 %v528_v21 }
  0xc8   : > { %532 = vadd.xlane.f32.xlu1 %v531_v23 }
 0x15c   : > { %v4136_v24 = vpop.f32.mrf.mxu0 }
 0x15d   : > { %v801_v25 = vpack.c.bf16 %v4136_v24, %v4136_v24 }
 0x15e   : > { %v705_v26 = vpop.f32.mrf.mxu0 }
 0x15f   : > { %4514 = vmatprep.subr.msk.bf16.mxu1 %vm822_vm2, %v801_v25  ;;  %v824_v27 = vsel %vm822_vm2, %v801_v25, 0 }
 0x160   : > { %v4137_v28 = vpop.f32.mrf.mxu0  ;;  %4159 = vmatpush3.bf16.msra.mxu1 %v824_v27 }
 0x162   : > { %v708_v31 = vpop.f32.mrf.mxu0 }
 0x163   : > { %v800_v32 = vpack.c.bf16 %v708_v31, %v705_v26 }
 0x164   : > { %v4140_v35 = vpop.f32.mrf.mxu0 }
 0x165   : > { %4160 = vmatprep.subr.bf16.mxu1 %v800_v32 }
 0x166   : > { %v721_v38 = vpop.f32.mrf.mxu0  ;;  %4161 = vmatpush3.bf16.msra.mxu1 %v800_v32 }
 0x167   : > { %v802_v47 = vpack.c.bf16 %v721_v38, %v4137_v28  ;;  %v5447_v38 = vpack.c.bf16 %v5369_v22, %v5369_v22  ;;  %v610_v22 = vld [vmem:[#allocation8] sm:$0xff] }
 0x168   : > { %v4141_v39 = vpop.f32.mrf.mxu0 }
 0x169   : > { %4163 = vmatmul.mubr.msk.bf16.vlgmr.msra.gmra.mxu1 %vm461_vm1, %v5377_v36  ;;  %v804_v58 = vpack.c.bf16 %v4141_v39, %v4140_v35  ;;  %v617_v39 = vld [vmem:[#allocation8 + $0x38] sm:$0xff] }
 0x16a   : > { %v724_v41 = vpop.f32.mrf.mxu0  ;;  %4170 = vmatprep.mubr.msk.bf16.mxu1 %vm461_vm1, %v5291_v29 }
 0x16b   : > { %v803_v42 = vpack.c.bf16 %v724_v41, %v724_v41  ;;  %v621_v41 = vpack.c.bf16 %v617_v39, %v616_v17 }
 0x16c   : > { %v4144_v44 = vpop.f32.mrf.mxu0 }
 0x16d   : > { %v881_v48 = vsel %vm822_vm2, %v803_v42, 0  ;;  %4515 = vmatprep.subr.msk.bf16.mxu1 %vm822_vm2, %v803_v42  ;;  %v614_v42 = vld [vmem:[#allocation8 + $0x20] sm:$0xff] }
 0x16e   : > { %v737_v49 = vpop.f32.mrf.mxu0  ;;  %4167 = vmatpush3.bf16.msra.mxu1 %v881_v48  ;;  %v612_v48 = vld [vmem:[#allocation8 + $0x10] sm:$0xff] }
 0x16f   : > { %v805_v45 = vpack.c.bf16 %v737_v49, %v737_v49  ;;  %4168 = vmatprep.subr.bf16.mxu1 %v802_v47  ;;  %v613_v49 = vld [vmem:[#allocation8 + $0x18] sm:$0xff] }
 0x170   : > { %v4145_v51 = vpop.f32.mrf.mxu0 }
 0x171   : > { %v938_v60 = vsel %vm822_vm2, %v805_v45, 0  ;;  %v807_v53 = vpack.c.bf16 %v4145_v51, %v4145_v51  ;;  %v611_v51 = vld [vmem:[#allocation8 + $0x8] sm:$0xff] }
 0x172   : > { %v740_v55 = vpop.f32.mrf.mxu0  ;;  %4169 = vmatpush3.bf16.msra.mxu1 %v802_v47 }
 0x173   : > { %4516 = vmatprep.subr.msk.bf16.mxu1 %vm822_vm2, %v805_v45  ;;  %v995_v5 = vsel %vm822_vm2, %v807_v53, 0  ;;  %v806_v6 = vpack.c.bf16 %v4144_v44, %v740_v55  ;;  %v615_v44 = vld [vmem:[#allocation8 + $0x28] sm:$0xff]  ;;  %v619_v45 = vpack.c.bf16 %v613_v49, %v612_v48  ;;  %v618_v55 = vpack.c.bf16 %v611_v51, %v610_v22 }
 0x174   : > { %v4148_v57 = vpop.f32.mrf.mxu0  ;;  %v620_v47 = vpack.c.bf16 %v615_v44, %v614_v42 }
 0x175   : > { %4171 = vmatmul.mubr.msk.bf16.vlgmr.msra.gmra.mxu1 %vm461_vm1, %v5387_v52  ;;  %v809_v9 = vpack.c.bf16 %v4148_v57, %v4148_v57  ;;  %v464_v57 = vpop.xlane.xlu0 %463 }
 0x176   : > { %v753_v61 = vpop.f32.mrf.mxu0  ;;  %4175 = vmatpush3.bf16.msra.mxu1 %v938_v60  ;;  %4178 = vmatprep.mubr.msk.bf16.mxu1 %vm461_vm1, %v5295_v33  ;;  %v534_v60 = vadd.f32 1.0, %v464_v57 }
 0x177   : > { %4176 = vmatprep.subr.bf16.mxu1 %v804_v58  ;;  %v1052_v12 = vsel %vm822_vm2, %v809_v9, 0 }
 0x178   : > { %v4149_v62 = vpop.f32.mrf.mxu0  ;;  %4623 = vrcp.f32 %v534_v60 }
 0x17a   : > { %v756_v2 = vpop.f32.mrf.mxu0  ;;  %4177 = vmatpush3.bf16.msra.mxu1 %v804_v58  ;;  %v470_v58 = vpop.xlane.xlu1 %469 }
 0x17b   : > { %4517 = vmatprep.subr.msk.bf16.mxu1 %vm822_vm2, %v807_v53  ;;  %v808_v15 = vpack.c.bf16 %v756_v2, %v753_v61  ;;  %v467_v61 = vpop.xlane.xlu0 %466 }
 0x17c   : > { %v4152_v3 = vpop.f32.mrf.mxu0  ;;  %v535_v53 = vadd.f32 1.0, %v467_v61 }
 0x17d   : > { %4179 = vmatmul.mubr.msk.bf16.vlgmr.msra.gmra.mxu1 %vm461_vm1, %v5397_v63 }
 0x17e   : > { %4183 = vmatpush3.bf16.msra.mxu1 %v995_v5  ;;  %4186 = vmatprep.mubr.msk.bf16.mxu1 %vm461_vm1, %v5299_v37  ;;  %v769_v8 = vpop.f32.mrf.mxu0  ;;  %4625 = vrcp.f32 %v535_v53 }
 0x17f   : > { %4184 = vmatprep.subr.bf16.mxu1 %v806_v6  ;;  %v810_v20 = vpack.c.bf16 %v769_v8, %v4149_v62  ;;  %v473_v62 = vpop.xlane.xlu1 %472  ;;  %v476_v2 = vpop.xlane.xlu0 %475 }
 0x180   : > { %v4153_v10 = vpop.f32.mrf.mxu0 }
 0x181   : > { %v812_v25 = vpack.c.bf16 %v4153_v10, %v4152_v3  ;;  %v536_v3 = vadd.f32 1.0, %v470_v58 }
 0x182   : > { %4185 = vmatpush3.bf16.msra.mxu1 %v806_v6  ;;  %v772_v16 = vpop.f32.mrf.mxu0  ;;  %v537_v6 = vadd.f32 1.0, %v473_v62 }
 0x183   : > { %4518 = vmatprep.subr.msk.bf16.mxu1 %vm822_vm2, %v809_v9  ;;  %v811_v18 = vpack.c.bf16 %v772_v16, %v772_v16  ;;  %v479_v5 = vpop.xlane.xlu1 %478  ;;  %4627 = vrcp.f32 %v536_v3  ;;  %v482_v10 = vpop.xlane.xlu0 %481 }
 0x184   : > { %v4156_v19 = vpop.f32.mrf.mxu0  ;;  %v539_v8 = vadd.f32 1.0, %v479_v5  ;;  %4629 = vrcp.f32 %v537_v6 }
 0x185   : > { %4187 = vmatmul.mubr.msk.bf16.vlgmr.msra.gmra.mxu1 %vm461_vm1, %v5407_v59  ;;  %v1109_v21 = vsel %vm822_vm2, %v811_v18, 0 }
 0x186   : > { %4191 = vmatpush3.bf16.msra.mxu1 %v1052_v12  ;;  %4194 = vmatprep.mubr.msk.bf16.mxu1 %vm461_vm1, %v5303_v40  ;;  %v785_v23 = vpop.f32.mrf.mxu0  ;;  %4631 = vrcp.f32 %v539_v8  ;;  %v538_v12 = vadd.f32 1.0, %v476_v2 }
 0x187   : > { %4192 = vmatprep.subr.bf16.mxu1 %v808_v15  ;;  %v813_v24 = vpack.c.bf16 %v785_v23, %v785_v23  ;;  %v485_v9 = vpop.xlane.xlu1 %484 }
 0x188   : > { %v4157_v27 = vpop.f32.mrf.mxu0  ;;  %4633 = vrcp.f32 %v538_v12 }
 0x189   : > { %v1166_v26 = vsel %vm822_vm2, %v813_v24, 0  ;;  %v815_v28 = vpack.c.bf16 %v4157_v27, %v4157_v27 }
 0x18a   : > { %4193 = vmatpush3.bf16.msra.mxu1 %v808_v15  ;;  %v788_v31 = vpop.f32.mrf.mxu0  ;;  %v5451_v15 = vpop.eup %4623 }
 0x18b   : > { %4519 = vmatprep.subr.msk.bf16.mxu1 %vm822_vm2, %v811_v18  ;;  %v1223_v32 = vsel %vm822_vm2, %v815_v28, 0  ;;  %v814_v35 = vpack.c.bf16 %v4156_v19, %v788_v31  ;;  %v491_v18 = vpop.xlane.xlu1 %490 }
 0x18c   : > { %v543_v44 = vadd.f32 1.0, %v491_v18 }
 0x18d   : > { %4195 = vmatmul.mubr.msk.bf16.vlgmr.msra.gmra.mxu1 %vm461_vm1, %v5417_v4 }
 0x18e   : > { %4199 = vmatpush3.bf16.msra.mxu1 %v1109_v21  ;;  %4202 = vmatprep.mubr.msk.bf16.mxu1 %vm461_vm1, %v5311_v46  ;;  %v540_v21 = vadd.f32 1.0, %v482_v10 }
 0x18f   : > { %4200 = vmatprep.subr.bf16.mxu1 %v810_v20  ;;  %v497_v17 = vpop.xlane.xlu1 %496 }
 0x190   : > { %4635 = vrcp.f32 %v540_v21  ;;  %v545_v22 = vadd.f32 1.0, %v497_v17 }
 0x192   : > { %4201 = vmatpush3.bf16.msra.mxu1 %v810_v20  ;;  %v488_v20 = vpop.xlane.xlu0 %487 }
 0x193   : > { %4520 = vmatprep.subr.msk.bf16.mxu1 %vm822_vm2, %v813_v24  ;;  %v5454_v24 = vpop.eup %4625  ;;  %v542_v27 = vadd.f32 1.0, %v488_v20  ;;  %v503_v51 = vpop.xlane.xlu1 %502 }
 0x195   : > { %4203 = vmatmul.mubr.msk.bf16.vlgmr.msra.gmra.mxu1 %vm461_vm1, %v5427_v7  ;;  %4637 = vrcp.f32 %v542_v27 }
 0x196   : > { %4207 = vmatpush3.bf16.msra.mxu1 %v1166_v26  ;;  %4210 = vmatprep.mubr.msk.bf16.mxu1 %vm461_vm1, %v5322_v54  ;;  %v494_v39 = vpop.xlane.xlu0 %493 }
 0x197   : > { %4208 = vmatprep.subr.bf16.mxu1 %v812_v25  ;;  %v544_v61 = vadd.f32 1.0, %v494_v39 }
 0x19a   : > { %4209 = vmatpush3.bf16.msra.mxu1 %v812_v25  ;;  %v5459_v25 = vld [vmem:[%s6090_s3] ss:$0 sm:$0xff]  ;;  %v500_v60 = vpop.xlane.xlu0 %499 }
 0x19b   : > { %4521 = vmatprep.subr.msk.bf16.mxu1 %vm822_vm2, %v815_v28  ;;  %v541_v28 = vadd.f32 1.0, %v485_v9  ;;  %v509_v9 = vpop.xlane.xlu1 %508  ;;  %v546_v10 = vadd.f32 1.0, %v500_v60 }
 0x19d   : > { %4211 = vmatmul.mubr.msk.bf16.vlgmr.msra.gmra.mxu1 %vm461_vm1, %v5437_v13  ;;  %4639 = vrcp.f32 %v541_v28 }
 0x19e   : > { %4215 = vmatpush3.bf16.msra.mxu1 %v1223_v32  ;;  %4218 = vmatprep.mubr.msk.bf16.mxu1 %vm461_vm1, %v5336_v0  ;;  %4641 = vrcp.f32 %v543_v44  ;;  %v506_v21 = vpop.xlane.xlu0 %505  ;;  %v547_v44 = vadd.f32 1.0, %v503_v51 }
 0x19f   : > { %4216 = vmatprep.subr.bf16.mxu1 %v814_v35  ;;  %4643 = vrcp.f32 %v545_v22 }
 0x1a0   : > { %4645 = vrcp.f32 %v544_v61 }
 0x1a1   : > { %4647 = vrcp.f32 %v546_v10 }
 0x1a2   : > { %4217 = vmatpush3.bf16.msra.mxu1 %v814_v35 }
 0x1a3   : > { %4222 = vmatprep.subr.bf16.mxu1 %v621_v41 }
 0x1a5   : > { %4219 = vmatmul.mubr.msk.bf16.vlgmr.msra.gmra.mxu1 %vm461_vm1, %v5447_v38 }
 0x1a6   : > { %4223 = vmatpush3.bf16.msra.mxu1 %v621_v41  ;;  %v5463_v41 = vpop.eup %4627 }
 0x1a7   : > { %4224 = vmatprep.subr.bf16.mxu1 %v620_v47 }
 0x1aa   : > { %4225 = vmatpush3.bf16.msra.mxu1 %v620_v47  ;;  %v5466_v47 = vpop.eup %4629 }
 0x1ab   : > { %4226 = vmatprep.subr.bf16.mxu1 %v619_v45 }
 0x1ae   : > { %4227 = vmatpush3.bf16.msra.mxu1 %v619_v45 }
 0x1af   : > { %4228 = vmatprep.subr.bf16.mxu1 %v618_v55 }
 0x1b2   : > { %4229 = vmatpush3.bf16.msra.mxu1 %v618_v55  ;;  %v5469_v55 = vpop.eup %4631 }
 0x1b3   : > { %v5475_v5 = vpop.eup %4633 }
 0x229   : > { %v4164_v16 = vpop.f32.mrf.mxu1 }
 0x22a   : > { %v1275_v48 = vmul.f32 %v5463_v41, %v4164_v16 }
 0x22b   : > { %v860_v19 = vpop.f32.mrf.mxu1 }
 0x22c   : > { %v1273_v23 = vmul.f32 %v5451_v15, %v860_v19  ;;  %v1306_v53 = vadd.f32 %v5459_v25, %v1275_v48 }
 0x22d   : > { %v4165_v26 = vpop.f32.mrf.mxu1 }
 0x22e   : > { %v1304_v32 = vadd.f32 %v5459_v25, %v1273_v23  ;;  %v1330_v16 = vmax.f32 %v1306_v53, 0.0  ;;  %v5480_v23 = vpop.eup %4635 }
 0x22f   : > { %v863_v31 = vpop.f32.mrf.mxu1 }
 0x230   : > { %v1274_v35 = vmul.f32 %v5454_v24, %v863_v31  ;;  %v1328_v49 = vmax.f32 %v1304_v32, 0.0  ;;  %v5483_v31 = vpop.eup %4637  ;;  %v548_v32 = vadd.f32 1.0, %v506_v21 }
 0x231   : > { %v5485_v17 = vpop.eup %4639 }
 0x232   : > { %v1305_v42 = vadd.f32 %v5459_v25, %v1274_v35  ;;  %4649 = vrcp.f32 %v548_v32  ;;  %v5490_v53 = vpop.eup %4641 }
 0x233   : > { %4651 = vrcp.f32 %v547_v44 }
 0x234   : > { %v1329_v45 = vmax.f32 %v1305_v42, 0.0 }
 0x235   : > { %v4172_v57 = vpop.f32.mrf.mxu1 }
 0x236   : > { %v1352_v58 = vpack.c.bf16 %v1329_v45, %v1328_v49  ;;  %v1278_v2 = vmul.f32 %v5469_v55, %v4172_v57  ;;  %v515_v49 = vpop.xlane.xlu1 %514  ;;  %v512_v45 = vpop.xlane.xlu0 %511 }
 0x237   : > { %v917_v62 = vpop.f32.mrf.mxu1 }
 0x238   : > { %v1276_v3 = vmul.f32 %v5466_v47, %v917_v62  ;;  %4230 = vmatprep.mubr.msk.bf16.mxu1 %vm634_vm0, %v1352_v58  ;;  %v1309_v18 = vadd.f32 %v5459_v25, %v1278_v2  ;;  %v549_v58 = vadd.f32 1.0, %v509_v9  ;;  %v551_v62 = vadd.f32 1.0, %v515_v49 }
 0x239   : > { %v4173_v6 = vpop.f32.mrf.mxu1 }
 0x23a   : > { %v1307_v8 = vadd.f32 %v5459_v25, %v1276_v3  ;;  %v1333_v39 = vmax.f32 %v1309_v18, 0.0  ;;  %v521_v3 = vpop.xlane.xlu1 %520  ;;  %v5495_v6 = vpop.eup %4643  ;;  %4653 = vrcp.f32 %v549_v58 }
 0x23b   : > { %v920_v12 = vpop.f32.mrf.mxu1  ;;  %v518_v10 = vpop.xlane.xlu0 %517  ;;  %4655 = vrcp.f32 %v551_v62 }
 0x23c   : > { %v1331_v19 = vmax.f32 %v1307_v8, 0.0  ;;  %v1277_v20 = vmul.f32 %v5475_v5, %v920_v12 }
 0x23d   : > { %v4180_v26 = vpop.f32.mrf.mxu1 }
 0x23e   : > { %v1353_v27 = vpack.c.bf16 %v1331_v19, %v1330_v16  ;;  %v1308_v28 = vadd.f32 %v5459_v25, %v1277_v20  ;;  %v1281_v60 = vmul.f32 %v5483_v31, %v4180_v26  ;;  %v550_v16 = vadd.f32 1.0, %v512_v45  ;;  %v5499_v19 = vpop.eup %4645 }
 0x23f   : > { %v974_v35 = vpop.f32.mrf.mxu1  ;;  %v524_v58 = vpop.xlane.xlu0 %523 }
 0x240   : > { %v1332_v42 = vmax.f32 %v1308_v28, 0.0  ;;  %v1279_v48 = vmul.f32 %v5480_v23, %v974_v35  ;;  %4231 = vmatmul.mubr.msk.bf16.vlgmr.msra.gmra.mxu1 %vm634_vm0, %v1353_v27  ;;  %v1312_v12 = vadd.f32 %v5459_v25, %v1281_v60  ;;  %4657 = vrcp.f32 %v550_v16 }
 0x241   : > { %v4181_v22 = vpop.f32.mrf.mxu1 }
 0x242   : > { %v1354_v57 = vpack.c.bf16 %v1333_v39, %v1332_v42  ;;  %v1310_v2 = vadd.f32 %v5459_v25, %v1279_v48  ;;  %v527_v39 = vpop.xlane.xlu1 %526  ;;  %v552_v42 = vadd.f32 1.0, %v518_v10  ;;  %v5504_v48 = vpop.eup %4647  ;;  %v1336_v49 = vmax.f32 %v1312_v12, 0.0 }
 0x243   : > { %v977_v61 = vpop.f32.mrf.mxu1  ;;  %v553_v12 = vadd.f32 1.0, %v521_v3 }
 0x244   : > { %v1280_v51 = vmul.f32 %v5485_v17, %v977_v61  ;;  %4234 = vmatprep.mubr.msk.bf16.mxu1 %vm634_vm0, %v1354_v57  ;;  %v1334_v20 = vmax.f32 %v1310_v2, 0.0  ;;  %4659 = vrcp.f32 %v552_v42  ;;  %v554_v2 = vadd.f32 1.0, %v524_v58 }
 0x245   : > { %v4188_v8 = vpop.f32.mrf.mxu1 }
 0x246   : > { %v1311_v9 = vadd.f32 %v5459_v25, %v1280_v51  ;;  %v1284_v26 = vmul.f32 %v5495_v6, %v4188_v8  ;;  %v5510_v8 = vpop.eup %4649  ;;  %4661 = vrcp.f32 %v554_v2 }
 0x247   : > { %v1031_v18 = vpop.f32.mrf.mxu1  ;;  %4663 = vrcp.f32 %v553_v12 }
 0x248   : > { %v1335_v21 = vmax.f32 %v1311_v9, 0.0  ;;  %v1282_v27 = vmul.f32 %v5490_v53, %v1031_v18  ;;  %v1315_v45 = vadd.f32 %v5459_v25, %v1284_v26  ;;  %v533_v18 = vpop.xlane.xlu1 %532 }
 0x249   : > { %v4189_v28 = vpop.f32.mrf.mxu1  ;;  %v557_v42 = vadd.f32 1.0, %v533_v18 }
 0x24a   : > { %v1355_v32 = vpack.c.bf16 %v1335_v21, %v1334_v20  ;;  %v1313_v35 = vadd.f32 %v5459_v25, %v1282_v27  ;;  %v1339_v9 = vmax.f32 %v1315_v45, 0.0  ;;  %v5514_v20 = vpop.eup %4651  ;;  %v555_v27 = vadd.f32 1.0, %v527_v39  ;;  %v530_v45 = vpop.xlane.xlu0 %529 }
 0x24b   : > { %v1034_v44 = vpop.f32.mrf.mxu1  ;;  %v5516_v28 = vpop.eup %4653 }
 0x24c   : > { %v1337_v22 = vmax.f32 %v1313_v35, 0.0  ;;  %v1283_v57 = vmul.f32 %v5499_v19, %v1034_v44  ;;  %4235 = vmatmul.mubr.msk.bf16.gmra.mxu1 %vm634_vm0, %v1355_v32  ;;  %v5519_v44 = vpop.eup %4655  ;;  %4665 = vrcp.f32 %v555_v27 }
 0x24d   : > { %v4196_v60 = vpop.f32.mrf.mxu1  ;;  %4667 = vrcp.f32 %v557_v42 }
 0x24e   : > { %v1356_v61 = vpack.c.bf16 %v1337_v22, %v1336_v49  ;;  %v1314_v62 = vadd.f32 %v5459_v25, %v1283_v57  ;;  %v1287_v32 = vmul.f32 %v5510_v8, %v4196_v60  ;;  %v556_v60 = vadd.f32 1.0, %v530_v45 }
 0x24f   : > { %v1088_v51 = vpop.f32.mrf.mxu1 }
 0x250   : > { %v1338_v10 = vmax.f32 %v1314_v62, 0.0  ;;  %v1285_v16 = vmul.f32 %v5504_v48, %v1088_v51  ;;  %4238 = vmatprep.mubr.msk.bf16.mxu1 %vm634_vm0, %v1356_v61  ;;  %v1318_v57 = vadd.f32 %v5459_v25, %v1287_v32  ;;  %v5526_v61 = vpop.eup %4657  ;;  %4669 = vrcp.f32 %v556_v60 }
 0x251   : > { %v4197_v21 = vpop.f32.mrf.mxu1 }
 0x252   : > { %v1357_v26 = vpack.c.bf16 %v1339_v9, %v1338_v10  ;;  %v1316_v3 = vadd.f32 %v5459_v25, %v1285_v16  ;;  %v5531_v21 = vpop.eup %4659 }
 0x253   : > { %v1091_v35 = vpop.f32.mrf.mxu1  ;;  %6130 = vst [vmem:[#allocation18_spill] sm:$0xff] %v5531_v21 }
 0x254   : > { %v1286_v49 = vmul.f32 %v5514_v20, %v1091_v35  ;;  %4239 = vmatmul.mubr.msk.bf16.gmra.mxu1 %vm634_vm0, %v1357_v26  ;;  %v1340_v62 = vmax.f32 %v1316_v3, 0.0  ;;  %v1342_v26 = vmax.f32 %v1318_v57, 0.0 }
 0x255   : > { %v4204_v22 = vpop.f32.mrf.mxu1 }
 0x256   : > { %v1317_v39 = vadd.f32 %v5459_v25, %v1286_v49  ;;  %v1290_v51 = vmul.f32 %v5519_v44, %v4204_v22  ;;  %v5537_v22 = vpop.eup %4661 }
 0x257   : > { %v1145_v58 = vpop.f32.mrf.mxu1  ;;  %v5541_v57 = vpop.eup %4663 }
 0x258   : > { %v1341_v2 = vmax.f32 %v1317_v39, 0.0  ;;  %v1288_v9 = vmul.f32 %v5516_v28, %v1145_v58  ;;  %v1321_v27 = vadd.f32 %v5459_v25, %v1290_v51  ;;  %6131 = vst [vmem:[#allocation19_spill] sm:$0xff] %v5541_v57 }
 0x259   : > { %v4205_v10 = vpop.f32.mrf.mxu1  ;;  %v5543_v51 = vpop.eup %4665 }
 0x25a   : > { %v1358_v12 = vpack.c.bf16 %v1341_v2, %v1340_v62  ;;  %v1319_v16 = vadd.f32 %v5459_v25, %v1288_v9  ;;  %v1345_v39 = vmax.f32 %v1321_v27, 0.0 }
 0x25b   : > { %v1148_v18 = vpop.f32.mrf.mxu1 }
 0x25c   : > { %v1343_v32 = vmax.f32 %v1319_v16, 0.0  ;;  %v1289_v35 = vmul.f32 %v5526_v61, %v1148_v18  ;;  %4242 = vmatprep.mubr.msk.bf16.mxu1 %vm634_vm0, %v1358_v12  ;;  %v5546_v12 = vpop.eup %4667 }
 0x25d   : > { %v4212_v42 = vpop.f32.mrf.mxu1 }
 0x25e   : > { %v1359_v3 = vpack.c.bf16 %v1343_v32, %v1342_v26  ;;  %v1320_v49 = vadd.f32 %v5459_v25, %v1289_v35  ;;  %v1293_v9 = vmul.f32 %v5537_v22, %v4212_v42 }
 0x25f   : > { %v1202_v45 = vpop.f32.mrf.mxu1 }
 0x260   : > { %v1344_v58 = vmax.f32 %v1320_v49, 0.0  ;;  %v1291_v60 = vmul.f32 %v5531_v21, %v1202_v45  ;;  %4243 = vmatmul.mubr.msk.bf16.gmra.mxu1 %vm634_vm0, %v1359_v3  ;;  %v1324_v32 = vadd.f32 %v5459_v25, %v1293_v9  ;;  %v5553_v3 = vpop.eup %4669 }
 0x261   : > { %v4213_v62 = vpop.f32.mrf.mxu1 }
 0x262   : > { %v1360_v2 = vpack.c.bf16 %v1345_v39, %v1344_v58  ;;  %v1322_v16 = vadd.f32 %v5459_v25, %v1291_v60 }
 0x263   : > { %v1205_v10 = vpop.f32.mrf.mxu1 }
 0x264   : > { %v1292_v18 = vmul.f32 %v5541_v57, %v1205_v10  ;;  %4246 = vmatprep.mubr.msk.bf16.mxu1 %vm634_vm0, %v1360_v2  ;;  %v1346_v49 = vmax.f32 %v1322_v16, 0.0  ;;  %v1348_v2 = vmax.f32 %v1324_v32, 0.0 }
 0x265   : > { %v4220_v26 = vpop.f32.mrf.mxu1 }
 0x266   : > { %v1323_v27 = vadd.f32 %v5459_v25, %v1292_v18  ;;  %v1296_v42 = vmul.f32 %v5546_v12, %v4220_v26 }
 0x267   : > { %v1259_v35 = vpop.f32.mrf.mxu1 }
 0x268   : > { %v1347_v45 = vmax.f32 %v1323_v27, 0.0  ;;  %v1294_v39 = vmul.f32 %v5543_v51, %v1259_v35  ;;  %v1327_v57 = vadd.f32 %v5459_v25, %v1296_v42 }
 0x269   : > { %v4221_v58 = vpop.f32.mrf.mxu1 }
 0x26a   : > { %v1361_v60 = vpack.c.bf16 %v1347_v45, %v1346_v49  ;;  %v1325_v62 = vadd.f32 %v5459_v25, %v1294_v39  ;;  %v1351_v27 = vmax.f32 %v1327_v57, 0.0 }
 0x26b   : > { %v1262_v10 = vpop.f32.mrf.mxu1 }
 0x26c   : > { %v1349_v18 = vmax.f32 %v1325_v62, 0.0  ;;  %v1295_v9 = vmul.f32 %v5553_v3, %v1262_v10  ;;  %4247 = vmatmul.mubr.msk.bf16.gmra.mxu1 %vm634_vm0, %v1361_v60 }
 0x26e   : > { %v1362_v21 = vpack.c.bf16 %v1349_v18, %v1348_v2  ;;  %v1326_v16 = vadd.f32 %v5459_v25, %v1295_v9 }
 0x270   : > { %v1350_v26 = vmax.f32 %v1326_v16, 0.0  ;;  %4250 = vmatprep.mubr.msk.bf16.mxu1 %vm634_vm0, %v1362_v21 }
 0x272   : > { %v1363_v35 = vpack.c.bf16 %v1351_v27, %v1350_v26 }
 0x274   : > { %4251 = vmatmul.mubr.msk.bf16.gmra.mxu1 %vm634_vm0, %v1363_v35 }
 0x275   : > { %4314 = vmatprep.mubr.msk.bf16.mxu1 %vm461_vm1, %v5336_v0 }
 0x300   : > { %v4232_v32 = vpop.f32.mrf.mxu1 }
 0x301   : > { %v1530_v49 = vpack.c.bf16 %v4232_v32, %v4232_v32 }
 0x302   : > { %v1434_v45 = vpop.f32.mrf.mxu1 }
 0x303   : > { %v1546_v42 = vsel %vm822_vm2, %v1530_v49, 0  ;;  %4522 = vmatprep.subr.msk.bf16.mxu0 %vm822_vm2, %v1530_v49 }
 0x304   : > { %v4233_v39 = vpop.f32.mrf.mxu1  ;;  %4255 = vmatpush3.bf16.msra.mxu0 %v1546_v42 }
 0x306   : > { %v1437_v25 = vpop.f32.mrf.mxu1 }
 0x307   : > { %v1529_v57 = vpack.c.bf16 %v1437_v25, %v1434_v45 }
 0x309   : > { %4256 = vmatprep.subr.bf16.mxu0 %v1529_v57 }
 0x30a   : > { %4257 = vmatpush3.bf16.msra.mxu0 %v1529_v57 }
 0x30c   : > { %v4236_v21 = vpop.f32.mrf.mxu1 }
 0x30d   : > { %4259 = vmatmul.mubr.msk.bf16.vlgmr.msra.gmra.mxu0 %vm461_vm1, %v5377_v36 }
 0x30e   : > { %v1450_v58 = vpop.f32.mrf.mxu1  ;;  %4266 = vmatprep.mubr.msk.bf16.mxu0 %vm461_vm1, %v5291_v29 }
 0x30f   : > { %v1531_v2 = vpack.c.bf16 %v1450_v58, %v4233_v39 }
 0x310   : > { %v4237_v0 = vpop.f32.mrf.mxu1 }
 0x311   : > { %v1533_v36 = vpack.c.bf16 %v4237_v0, %v4236_v21 }
 0x312   : > { %v1453_v60 = vpop.f32.mrf.mxu1 }
 0x313   : > { %v1532_v62 = vpack.c.bf16 %v1453_v60, %v1453_v60 }
 0x314   : > { %v4240_v10 = vpop.f32.mrf.mxu1 }
 0x315   : > { %v1597_v18 = vsel %vm822_vm2, %v1532_v62, 0  ;;  %4523 = vmatprep.subr.msk.bf16.mxu0 %vm822_vm2, %v1532_v62 }
 0x316   : > { %v1466_v9 = vpop.f32.mrf.mxu1  ;;  %4263 = vmatpush3.bf16.msra.mxu0 %v1597_v18 }
 0x317   : > { %4264 = vmatprep.subr.bf16.mxu0 %v1531_v2  ;;  %v1534_v16 = vpack.c.bf16 %v1466_v9, %v1466_v9 }
 0x318   : > { %v4241_v27 = vpop.f32.mrf.mxu1 }
 0x319   : > { %v1648_v29 = vsel %vm822_vm2, %v1534_v16, 0  ;;  %v1536_v32 = vpack.c.bf16 %v4241_v27, %v4241_v27 }
 0x31a   : > { %4265 = vmatpush3.bf16.msra.mxu0 %v1531_v2  ;;  %v1469_v26 = vpop.f32.mrf.mxu1 }
 0x31b   : > { %4524 = vmatprep.subr.msk.bf16.mxu0 %vm822_vm2, %v1534_v16  ;;  %v1699_v45 = vsel %vm822_vm2, %v1536_v32, 0  ;;  %v1535_v42 = vpack.c.bf16 %v4240_v10, %v1469_v26 }
 0x31d   : > { %4267 = vmatmul.mubr.msk.bf16.vlgmr.msra.gmra.mxu0 %vm461_vm1, %v5387_v52 }
 0x31e   : > { %4271 = vmatpush3.bf16.msra.mxu0 %v1648_v29  ;;  %4274 = vmatprep.mubr.msk.bf16.mxu0 %vm461_vm1, %v5295_v33 }
 0x31f   : > { %4272 = vmatprep.subr.bf16.mxu0 %v1533_v36 }
 0x320   : > { %v4244_v35 = vpop.f32.mrf.mxu1 }
 0x321   : > { %v1538_v33 = vpack.c.bf16 %v4244_v35, %v4244_v35 }
 0x322   : > { %v1482_v49 = vpop.f32.mrf.mxu1  ;;  %4273 = vmatpush3.bf16.msra.mxu0 %v1533_v36 }
 0x323   : > { %4525 = vmatprep.subr.msk.bf16.mxu0 %vm822_vm2, %v1536_v32  ;;  %v1750_v57 = vsel %vm822_vm2, %v1538_v33, 0 }
 0x324   : > { %v4245_v39 = vpop.f32.mrf.mxu1 }
 0x325   : > { %4275 = vmatmul.mubr.msk.bf16.vlgmr.msra.gmra.mxu0 %vm461_vm1, %v5397_v63 }
 0x326   : > { %4279 = vmatpush3.bf16.msra.mxu0 %v1699_v45  ;;  %4282 = vmatprep.mubr.msk.bf16.mxu0 %vm461_vm1, %v5299_v37  ;;  %v1485_v52 = vpop.f32.mrf.mxu1 }
 0x327   : > { %4280 = vmatprep.subr.bf16.mxu0 %v1535_v42  ;;  %v1537_v21 = vpack.c.bf16 %v1485_v52, %v1482_v49 }
 0x32a   : > { %4281 = vmatpush3.bf16.msra.mxu0 %v1535_v42 }
 0x32b   : > { %4526 = vmatprep.subr.msk.bf16.mxu0 %vm822_vm2, %v1538_v33 }
 0x32c   : > { %v4248_v25 = vpop.f32.mrf.mxu1 }
 0x32d   : > { %4283 = vmatmul.mubr.msk.bf16.vlgmr.msra.gmra.mxu0 %vm461_vm1, %v5407_v59 }
 0x32e   : > { %v1498_v58 = vpop.f32.mrf.mxu1  ;;  %4287 = vmatpush3.bf16.msra.mxu0 %v1750_v57  ;;  %4290 = vmatprep.mubr.msk.bf16.mxu0 %vm461_vm1, %v5303_v40 }
 0x32f   : > { %4288 = vmatprep.subr.bf16.mxu0 %v1537_v21  ;;  %v1539_v62 = vpack.c.bf16 %v1498_v58, %v4245_v39 }
 0x330   : > { %v4249_v37 = vpop.f32.mrf.mxu1 }
 0x332   : > { %v1501_v63 = vpop.f32.mrf.mxu1  ;;  %4289 = vmatpush3.bf16.msra.mxu0 %v1537_v21 }
 0x333   : > { %v1540_v0 = vpack.c.bf16 %v1501_v63, %v1501_v63 }
 0x334   : > { %v4252_v60 = vpop.f32.mrf.mxu1 }
 0x335   : > { %v1801_v10 = vsel %vm822_vm2, %v1540_v0, 0  ;;  %4291 = vmatmul.mubr.msk.bf16.vlgmr.msra.gmra.mxu0 %vm461_vm1, %v5417_v4  ;;  %4527 = vmatprep.subr.msk.bf16.mxu0 %vm822_vm2, %v1540_v0  ;;  %v1541_v4 = vpack.c.bf16 %v4249_v37, %v4248_v25 }
 0x336   : > { %v1514_v59 = vpop.f32.mrf.mxu1  ;;  %4295 = vmatpush3.bf16.msra.mxu0 %v1801_v10  ;;  %4298 = vmatprep.mubr.msk.bf16.mxu0 %vm461_vm1, %v5311_v46  ;;  %v4922_v46 = vmov 0.0   ;;  %v2059_v10 = vrot.slane %v5235_v43, 4 }
 0x337   : > { %4296 = vmatprep.subr.bf16.mxu0 %v1539_v62  ;;  %v1542_v2 = vpack.c.bf16 %v1514_v59, %v1514_v59 }
 0x338   : > { %v4253_v40 = vpop.f32.mrf.mxu1 }
 0x339   : > { %v1544_v18 = vpack.c.bf16 %v4253_v40, %v4253_v40  ;;  %v1852_v36 = vsel %vm822_vm2, %v1542_v2, 0 }
 0x33a   : > { %v1517_v9 = vpop.f32.mrf.mxu1  ;;  %4297 = vmatpush3.bf16.msra.mxu0 %v1539_v62 }
 0x33b   : > { %v1903_v16 = vsel %vm822_vm2, %v1544_v18, 0  ;;  %v1543_v27 = vpack.c.bf16 %v4252_v60, %v1517_v9  ;;  %4528 = vmatprep.subr.msk.bf16.mxu0 %vm822_vm2, %v1542_v2  ;;  %4529 = vmatprep.subr.msk.bf16.mxu1 %vm822_vm2, %v1544_v18  ;;  %v2060_v18 = vadd.f32 %v2059_v10, %v5235_v43  ;;  %v2070_v43 = vrot.slane %v5242_v50, 4 }
 0x33c   : > { %4311 = vmatpush3.bf16.msra.mxu1 %v1903_v16 }
 0x33d   : > { %4299 = vmatmul.mubr.msk.bf16.vlgmr.msra.gmra.mxu0 %vm461_vm1, %v5427_v7  ;;  %4312 = vmatprep.subr.bf16.mxu1 %v1543_v27 }
 0x33e   : > { %4303 = vmatpush3.bf16.msra.mxu0 %v1852_v36  ;;  %4306 = vmatprep.mubr.msk.bf16.mxu0 %vm461_vm1, %v5322_v54  ;;  %v2037_v54 = vrot.slane %v5222_v30, 4 }
 0x33f   : > { %4304 = vmatprep.subr.bf16.mxu0 %v1541_v4 }
 0x340   : > { %4313 = vmatpush3.bf16.msra.mxu1 %v1543_v27  ;;  %v2038_v7 = vadd.f32 %v2037_v54, %v5222_v30 }
 0x341   : > { %4327 = vmatprep.subr.mxu1 %v4922_v46 }
 0x342   : > { %4305 = vmatpush3.bf16.msra.mxu0 %v1541_v4  ;;  %v2039_v32 = vrot.slane %v2038_v7, 2 }
 0x343   : > { %4315 = vmatmul.mubr.msk.bf16.vlgmr.msra.gmra.mxu1 %vm461_vm1, %v5447_v38  ;;  %4318 = vmatprep.subr.mxu0 %v4922_v46 }
 0x344   : > { %4333 = vmatprep.mubr.msk.f32.mxu1 %vm4923_vm3, %v4922_v46  ;;  %v2040_v33 = vadd.f32 %v2039_v32, %v2038_v7  ;;  %v2061_v7 = vrot.slane %v2060_v18, 2 }
 0x345   : > { %4307 = vmatmul.mubr.msk.bf16.vlgmr.msra.gmra.mxu0 %vm461_vm1, %v5437_v13  ;;  %v5621_v13 = vld [vmem:[%s6092_s5] ss:$0 sm:$0xff] }
 0x346   : > { %4324 = vmatprep.mubr.msk.f32.mxu0 %vm4923_vm3, %v4922_v46  ;;  %v2041_v57 = vrot.slane %v2040_v33, 1 }
 0x348   : > { %v2042_v37 = vadd.f32 %v2041_v57, %v2040_v33  ;;  %v2062_v57 = vadd.f32 %v2061_v7, %v2060_v18 }
 0x3cd   : > { %v4260_v38 = vpop.f32.mrf.mxu0 }
 0x3ce   : > { %v1955_v29 = vmul.f32 %v5463_v41, %v4260_v38 }
 0x3cf   : > { %v1582_v26 = vpop.f32.mrf.mxu0 }
 0x3d0   : > { %v5625_v35 = vadd.f32 %v5621_v13, %v1955_v29  ;;  %v1953_v39 = vmul.f32 %v5451_v15, %v1582_v26  ;;  %v2048_v15 = vrot.slane %v5227_v34, 4 }
 0x3d1   : > { %v4261_v49 = vpop.f32.mrf.mxu0 }
 0x3d2   : > { %v2010_v45 = vmax.f32 %v5625_v35, 0.0  ;;  %v5638_v52 = vadd.f32 %v5621_v13, %v1953_v39  ;;  %v2049_v21 = vadd.f32 %v2048_v15, %v5227_v34  ;;  %v2071_v39 = vadd.f32 %v2070_v43, %v5242_v50 }
 0x3d3   : > { %v1585_v42 = vpop.f32.mrf.mxu0 }
 0x3d4   : > { %v1954_v30 = vmul.f32 %v5454_v24, %v1585_v42  ;;  %4319 = vmatpush3.xpose.msk.msra.mxu0 %vm634_vm0, %v2010_v45  ;;  %v2008_v24 = vmax.f32 %v5638_v52, 0.0  ;;  %v2050_v62 = vrot.slane %v2049_v21, 2  ;;  %v2866_v52 = vld [vmem:[#allocation10 + $0x8] sm:$0xff] }
 0x3d5   : > { %4320 = vmatprep.subr.mxu0 %v4922_v46 }
 0x3d6   : > { %v5635_v41 = vadd.f32 %v5621_v13, %v1954_v30  ;;  %v2051_v16 = vadd.f32 %v2050_v62, %v2049_v21 }
 0x3d8   : > { %v2009_v25 = vmax.f32 %v5635_v41, 0.0  ;;  %v2052_v29 = vrot.slane %v2051_v16, 1 }
 0x3da   : > { %4321 = vmatpush3.xpose.msk.msra.mxu0 %vm634_vm0, %v2009_v25  ;;  %v2053_v33 = vadd.f32 %v2052_v29, %v2051_v16 }
 0x3db   : > { %4322 = vmatprep.subr.mxu0 %v4922_v46 }
 0x3dd   : > { %v4268_v58 = vpop.f32.mrf.mxu0 }
 0x3de   : > { %v1958_v63 = vmul.f32 %v5469_v55, %v4268_v58  ;;  %4323 = vmatpush3.xpose.msk.msra.mxu0 %vm634_vm0, %v2008_v24 }
 0x3df   : > { %v1633_v0 = vpop.f32.mrf.mxu0  ;;  %4336 = vmatprep.subr.mxu0 %v4922_v46 }
 0x3e0   : > { %v5654_v60 = vadd.f32 %v5621_v13, %v1958_v63  ;;  %v1956_v40 = vmul.f32 %v5466_v47, %v1633_v0  ;;  %v2081_v63 = vrot.slane %v5248_v56, 4 }
 0x3e1   : > { %v4269_v59 = vpop.f32.mrf.mxu0  ;;  %4325 = vmatmul.mubr.msk.f32.vlgmr.msra.gmra.mxu0 %vm634_vm0, %v2042_v37  ;;  %v2072_v37 = vrot.slane %v2071_v39, 2 }
 0x3e2   : > { %v2013_v34 = vmax.f32 %v5654_v60, 0.0  ;;  %4342 = vmatprep.mubr.msk.f32.mxu0 %vm4923_vm3, %v4922_v46  ;;  %v5673_v47 = vadd.f32 %v5621_v13, %v1956_v40 }
 0x3e3   : > { %v1636_v55 = vpop.f32.mrf.mxu0  ;;  %v2073_v16 = vadd.f32 %v2072_v37, %v2071_v39 }
 0x3e4   : > { %v1957_v2 = vmul.f32 %v5475_v5, %v1636_v55  ;;  %4328 = vmatpush3.xpose.msk.msra.mxu1 %vm634_vm0, %v2013_v34  ;;  %v2011_v32 = vmax.f32 %v5673_v47, 0.0 }
 0x3e5   : > { %v4276_v9 = vpop.f32.mrf.mxu0  ;;  %4329 = vmatprep.subr.mxu1 %v4922_v46 }
 0x3e6   : > { %v5669_v27 = vadd.f32 %v5621_v13, %v1957_v2  ;;  %v1961_v4 = vmul.f32 %v5483_v31, %v4276_v9  ;;  %v2082_v2 = vadd.f32 %v2081_v63, %v5248_v56 }
 0x3e7   : > { %v1684_v36 = vpop.f32.mrf.mxu0 }
 0x3e8   : > { %v2012_v5 = vmax.f32 %v5669_v27, 0.0  ;;  %v5677_v54 = vadd.f32 %v5621_v13, %v1961_v4  ;;  %v1959_v49 = vmul.f32 %v5480_v23, %v1684_v36  ;;  %v2083_v43 = vrot.slane %v2082_v2, 2 }
 0x3e9   : > { %v4277_v38 = vpop.f32.mrf.mxu0 }
 0x3ea   : > { %v2016_v26 = vmax.f32 %v5677_v54, 0.0  ;;  %4330 = vmatpush3.xpose.msk.msra.mxu1 %vm634_vm0, %v2012_v5  ;;  %v2092_v38 = vrot.slane %v5258_v1, 4 }
 0x3eb   : > { %v1687_v31 = vpop.f32.mrf.mxu0  ;;  %4331 = vmatprep.subr.mxu1 %v4922_v46 }
 0x3ec   : > { %v1960_v42 = vmul.f32 %v5485_v17, %v1687_v31  ;;  %4337 = vmatpush3.xpose.msk.msra.mxu0 %vm634_vm0, %v2016_v26  ;;  %v5702_v17 = vadd.f32 %v5621_v13, %v1959_v49 }
 0x3ed   : > { %v4284_v30 = vpop.f32.mrf.mxu0  ;;  %4338 = vmatprep.subr.mxu0 %v4922_v46 }
 0x3ee   : > { %v5694_v15 = vadd.f32 %v5621_v13, %v1960_v42  ;;  %v1964_v21 = vmul.f32 %v5495_v6, %v4284_v30  ;;  %4332 = vmatpush3.xpose.msk.msra.mxu1 %vm634_vm0, %v2011_v32  ;;  %v2063_v6 = vrot.slane %v2062_v57, 1  ;;  %v2014_v59 = vmax.f32 %v5702_v17, 0.0 }
 0x3ef   : > { %v1735_v23 = vpop.f32.mrf.mxu0  ;;  %4345 = vmatprep.subr.mxu1 %v4922_v46 }
 0x3f0   : > { %v2015_v50 = vmax.f32 %v5694_v15, 0.0  ;;  %v5706_v58 = vadd.f32 %v5621_v13, %v1964_v21  ;;  %v1962_v55 = vmul.f32 %v5490_v53, %v1735_v23  ;;  %v2064_v9 = vadd.f32 %v2063_v6, %v2062_v57 }
 0x3f1   : > { %v4285_v0 = vpop.f32.mrf.mxu0  ;;  %4334 = vmatmul.mubr.msk.f32.vlgmr.msra.gmra.mxu1 %vm634_vm0, %v2053_v33  ;;  %v2093_v33 = vadd.f32 %v2092_v38, %v5258_v1  ;;  %v2084_v23 = vadd.f32 %v2083_v43, %v2082_v2  ;;  %v2114_v43 = vrot.slane %v5273_v14, 4 }
 0x3f2   : > { %v2019_v62 = vmax.f32 %v5706_v58, 0.0  ;;  %4339 = vmatpush3.xpose.msk.msra.mxu0 %vm634_vm0, %v2015_v50  ;;  %4351 = vmatprep.mubr.msk.f32.mxu1 %vm4923_vm3, %v4922_v46 }
 0x3f3   : > { %v1738_v10 = vpop.f32.mrf.mxu0  ;;  %4340 = vmatprep.subr.mxu0 %v4922_v46  ;;  %v2094_v6 = vrot.slane %v2093_v33, 2 }
 0x3f4   : > { %v1963_v40 = vmul.f32 %v5499_v19, %v1738_v10  ;;  %4346 = vmatpush3.xpose.msk.msra.mxu1 %vm634_vm0, %v2019_v62  ;;  %v5734_v19 = vadd.f32 %v5621_v13, %v1962_v55  ;;  %v2103_v10 = vrot.slane %v5270_v11, 4 }
 0x3f5   : > { %v4292_v18 = vpop.f32.mrf.mxu0  ;;  %4347 = vmatprep.subr.mxu1 %v4922_v46 }
 0x3f6   : > { %v5726_v4 = vadd.f32 %v5621_v13, %v1963_v40  ;;  %v1967_v36 = vmul.f32 %v5510_v8, %v4292_v18  ;;  %4341 = vmatpush3.xpose.msk.msra.mxu0 %vm634_vm0, %v2014_v59  ;;  %v2074_v8 = vrot.slane %v2073_v16, 1  ;;  %v2017_v42 = vmax.f32 %v5734_v19, 0.0 }
 0x3f7   : > { %v1786_v53 = vpop.f32.mrf.mxu0  ;;  %4354 = vmatprep.subr.mxu0 %v4922_v46 }
 0x3f8   : > { %v2018_v56 = vmax.f32 %v5726_v4, 0.0  ;;  %v5738_v7 = vadd.f32 %v5621_v13, %v1967_v36  ;;  %v1965_v39 = vmul.f32 %v5504_v48, %v1786_v53  ;;  %v2075_v21 = vadd.f32 %v2074_v8, %v2073_v16 }
 0x3f9   : > { %v4293_v29 = vpop.f32.mrf.mxu0  ;;  %4343 = vmatmul.mubr.msk.f32.vlgmr.msra.gmra.mxu0 %vm634_vm0, %v2064_v9  ;;  %v2104_v53 = vadd.f32 %v2103_v10, %v5270_v11 }
 0x3fa   : > { %v2022_v31 = vmax.f32 %v5738_v7, 0.0  ;;  %4348 = vmatpush3.xpose.msk.msra.mxu1 %vm634_vm0, %v2018_v56  ;;  %4360 = vmatprep.mubr.msk.f32.mxu0 %vm4923_vm3, %v4922_v46 }
 0x3fb   : > { %v1789_v49 = vpop.f32.mrf.mxu0  ;;  %4349 = vmatprep.subr.mxu1 %v4922_v46 }
 0x3fc   : > { %v1966_v30 = vmul.f32 %v5514_v20, %v1789_v49  ;;  %4355 = vmatpush3.xpose.msk.msra.mxu0 %vm634_vm0, %v2022_v31  ;;  %v5766_v20 = vadd.f32 %v5621_v13, %v1965_v39 }
 0x3fd   : > { %v4300_v57 = vpop.f32.mrf.mxu0  ;;  %4356 = vmatprep.subr.mxu0 %v4922_v46 }
 0x3fe   : > { %v5758_v37 = vadd.f32 %v5621_v13, %v1966_v30  ;;  %v1970_v63 = vmul.f32 %v5519_v44, %v4300_v57  ;;  %4350 = vmatpush3.xpose.msk.msra.mxu1 %vm634_vm0, %v2017_v42  ;;  %v2085_v44 = vrot.slane %v2084_v23, 1  ;;  %v2020_v16 = vmax.f32 %v5766_v20, 0.0 }
 0x3ff   : > { %v1837_v48 = vpop.f32.mrf.mxu0  ;;  %4363 = vmatprep.subr.mxu1 %v4922_v46 }
 0x400   : > { %v2021_v1 = vmax.f32 %v5758_v37, 0.0  ;;  %v5770_v0 = vadd.f32 %v5621_v13, %v1970_v63  ;;  %v1968_v2 = vmul.f32 %v5516_v28, %v1837_v48  ;;  %v2086_v8 = vadd.f32 %v2085_v44, %v2084_v23  ;;  %v6132_v44 = vld [vmem:[#allocation18_spill] sm:$0xff] }
 0x401   : > { %v4301_v55 = vpop.f32.mrf.mxu0  ;;  %4352 = vmatmul.mubr.msk.f32.vlgmr.msra.gmra.mxu1 %vm634_vm0, %v2075_v21  ;;  %v2095_v28 = vadd.f32 %v2094_v6, %v2093_v33  ;;  %v2105_v23 = vrot.slane %v2104_v53, 2 }
 0x402   : > { %v2025_v40 = vmax.f32 %v5770_v0, 0.0  ;;  %4357 = vmatpush3.xpose.msk.msra.mxu0 %vm634_vm0, %v2021_v1  ;;  %4369 = vmatprep.mubr.msk.f32.mxu1 %vm4923_vm3, %v4922_v46 }
 0x403   : > { %v1840_v18 = vpop.f32.mrf.mxu0  ;;  %v4316_v9 = vpop.f32.mrf.mxu1  ;;  %4358 = vmatprep.subr.mxu0 %v4922_v46  ;;  %v2096_v6 = vrot.slane %v2095_v28, 1 }
 0x404   : > { %v1969_v36 = vmul.f32 %v5526_v61, %v1840_v18  ;;  %4364 = vmatpush3.xpose.msk.msra.mxu1 %vm634_vm0, %v2025_v40  ;;  %v5798_v61 = vadd.f32 %v5621_v13, %v1968_v2  ;;  %v1976_v33 = vmul.f32 %v5546_v12, %v4316_v9  ;;  %v6133_v9 = vld [vmem:[#allocation19_spill] sm:$0xff] }
 0x405   : > { %v4308_v38 = vpop.f32.mrf.mxu0  ;;  %v1939_v29 = vpop.f32.mrf.mxu1  ;;  %4365 = vmatprep.subr.mxu1 %v4922_v46 }
 0x406   : > { %v5791_v49 = vadd.f32 %v5621_v13, %v1969_v36  ;;  %v1973_v39 = vmul.f32 %v5537_v22, %v4308_v38  ;;  %4359 = vmatpush3.xpose.msk.msra.mxu0 %vm634_vm0, %v2020_v16  ;;  %v2115_v22 = vadd.f32 %v2114_v43, %v5273_v14  ;;  %v2023_v12 = vmax.f32 %v5798_v61, 0.0 }
 0x407   : > { %v1888_v11 = vpop.f32.mrf.mxu0  ;;  %v4317_v30 = vpop.f32.mrf.mxu1  ;;  %4372 = vmatprep.subr.mxu0 %v4922_v46  ;;  %v5817_v14 = vadd.f32 %v5621_v13, %v1976_v33  ;;  %v2097_v38 = vadd.f32 %v2096_v6, %v2095_v28 }
 0x408   : > { %v2024_v57 = vmax.f32 %v5791_v49, 0.0  ;;  %v5804_v21 = vadd.f32 %v5621_v13, %v1973_v39  ;;  %v1971_v2 = vmul.f32 %v6132_v44, %v1888_v11  ;;  %v2116_v43 = vrot.slane %v2115_v22, 2  ;;  %v2871_v44 = vld [vmem:[#allocation10 + $0x30] sm:$0xff] }
 0x409   : > { %v4309_v63 = vpop.f32.mrf.mxu0  ;;  %v1942_v48 = vpop.f32.mrf.mxu1  ;;  %4361 = vmatmul.mubr.msk.f32.vlgmr.msra.gmra.mxu0 %vm634_vm0, %v2086_v8  ;;  %v2106_v8 = vadd.f32 %v2105_v23, %v2104_v53  ;;  %v2031_v11 = vmax.f32 %v5817_v14, 0.0 }
 0x40a   : > { %v2028_v10 = vmax.f32 %v5804_v21, 0.0  ;;  %4366 = vmatpush3.xpose.msk.msra.mxu1 %vm634_vm0, %v2024_v57  ;;  %4378 = vmatprep.mubr.msk.f32.mxu0 %vm4923_vm3, %v4922_v46  ;;  %v1975_v18 = vmul.f32 %v5553_v3, %v1942_v48  ;;  %v1974_v3 = vmul.f32 %v5543_v51, %v1939_v29  ;;  %v5836_v30 = vadd.f32 %v5621_v13, %v1971_v2  ;;  %v2872_v48 = vld [vmem:[#allocation10 + $0x38] sm:$0xff]  ;;  %v2870_v2 = vld [vmem:[#allocation10 + $0x28] sm:$0xff] }
 0x40b   : > { %v1891_v55 = vpop.f32.mrf.mxu0  ;;  %4367 = vmatprep.subr.mxu1 %v4922_v46  ;;  %v2107_v33 = vrot.slane %v2106_v8, 1  ;;  %v2117_v23 = vadd.f32 %v2116_v43, %v2115_v22 }
 0x40c   : > { %v1972_v36 = vmul.f32 %v6133_v9, %v1891_v55  ;;  %4373 = vmatpush3.xpose.msk.msra.mxu0 %vm634_vm0, %v2028_v10  ;;  %v5839_v28 = vadd.f32 %v5621_v13, %v1975_v18  ;;  %v2005_v51 = vadd.f32 %v5621_v13, %v1974_v3  ;;  %v2026_v29 = vmax.f32 %v5836_v30, 0.0  ;;  %v2869_v18 = vld [vmem:[#allocation10 + $0x20] sm:$0xff]  ;;  %v2868_v9 = vld [vmem:[#allocation10 + $0x18] sm:$0xff] }
 0x40d   : > { %4374 = vmatprep.subr.mxu0 %v4922_v46  ;;  %v2108_v22 = vadd.f32 %v2107_v33, %v2106_v8  ;;  %v2118_v6 = vrot.slane %v2117_v23, 1 }
 0x40e   : > { %v5827_v39 = vadd.f32 %v5621_v13, %v1972_v36  ;;  %4368 = vmatpush3.xpose.msk.msra.mxu1 %vm634_vm0, %v2023_v12  ;;  %v2030_v63 = vmax.f32 %v5839_v28, 0.0  ;;  %v2029_v55 = vmax.f32 %v2005_v51, 0.0  ;;  %v2867_v36 = vld [vmem:[#allocation10 + $0x10] sm:$0xff] }
 0x40f   : > { %4381 = vmatprep.subr.mxu1 %v4922_v46  ;;  %v2119_v13 = vadd.f32 %v2118_v6, %v2117_v23 }
 0x410   : > { %v2027_v53 = vmax.f32 %v5827_v39, 0.0 }
 0x411   : > { %4370 = vmatmul.mubr.msk.f32.vlgmr.msra.gmra.mxu1 %vm634_vm0, %v2097_v38 }
 0x412   : > { %4375 = vmatpush3.xpose.msk.msra.mxu0 %vm634_vm0, %v2027_v53  ;;  %4382 = vmatpush3.xpose.msk.msra.mxu1 %vm634_vm0, %v2031_v11 }
 0x413   : > { %4376 = vmatprep.subr.mxu0 %v4922_v46  ;;  %4383 = vmatprep.subr.mxu1 %v4922_v46 }
 0x414   : > { %4387 = vmatprep.mubr.msk.f32.mxu1 %vm4923_vm3, %v4922_v46 }
 0x416   : > { %4377 = vmatpush3.xpose.msk.msra.mxu0 %vm634_vm0, %v2026_v29  ;;  %4384 = vmatpush3.xpose.msk.msra.mxu1 %vm634_vm0, %v2030_v63 }
 0x417   : > { %4385 = vmatprep.subr.mxu1 %v4922_v46  ;;  %4390 = vmatprep.subr.mxu0 %v2872_v48 }
 0x419   : > { %4379 = vmatmul.mubr.msk.f32.vlgmr.msra.gmra.mxu0 %vm634_vm0, %v2108_v22 }
 0x41a   : > { %4386 = vmatpush3.xpose.msk.msra.mxu1 %vm634_vm0, %v2029_v55  ;;  %4391 = vmatpush3.msra.mxu0 %v2872_v48 }
 0x41b   : > { %4406 = vmatprep.mubr.msk.f32.mxu0 %vm634_vm0, %v2008_v24  ;;  %4392 = vmatprep.subr.mxu0 %v2871_v44  ;;  %v2865_v24 = vld [vmem:[#allocation10] sm:$0xff] }
 0x41c   : > { %4393 = vmatpush3.msra.mxu0 %v2871_v44  ;;  %4442 = vmatprep.subr.mxu1 %v4922_v46 }
 0x41d   : > { %4388 = vmatmul.mubr.msk.f32.vlgmr.msra.gmra.mxu1 %vm634_vm0, %v2119_v13  ;;  %4394 = vmatprep.subr.mxu0 %v2870_v2 }
 0x41e   : > { %4395 = vmatpush3.msra.mxu0 %v2870_v2  ;;  %4448 = vmatprep.mubr.msk.f32.mxu1 %vm4923_vm3, %v4922_v46 }
 0x41f   : > { %4396 = vmatprep.subr.mxu0 %v2869_v18 }
 0x420   : > { %4397 = vmatpush3.msra.mxu0 %v2869_v18 }
 0x421   : > { %4398 = vmatprep.subr.mxu0 %v2868_v9 }
 0x422   : > { %4399 = vmatpush3.msra.mxu0 %v2868_v9 }
 0x423   : > { %4400 = vmatprep.subr.mxu0 %v2867_v36 }
 0x424   : > { %4401 = vmatpush3.msra.mxu0 %v2867_v36 }
 0x425   : > { %4402 = vmatprep.subr.mxu0 %v2866_v52 }
 0x426   : > { %4403 = vmatpush3.msra.mxu0 %v2866_v52 }
 0x427   : > { %4404 = vmatprep.subr.mxu0 %v2865_v24 }
 0x428   : > { %4405 = vmatpush3.msra.mxu0 %v2865_v24 }
 0x429   : > { %4407 = vmatmul.mubr.msk.f32.vlgmr.msra.gmra.mxu0 %vm634_vm0, %v2009_v25 }
 0x42a   : > { %4409 = vmatprep.mubr.msk.f32.mxu0 %vm634_vm0, %v2010_v45 }
 0x42d   : > { %4410 = vmatmul.mubr.msk.f32.gmra.mxu0 %vm634_vm0, %v2011_v32 }
 0x42e   : > { %4412 = vmatprep.mubr.msk.f32.mxu0 %vm634_vm0, %v2012_v5 }
 0x431   : > { %4413 = vmatmul.mubr.msk.f32.gmra.mxu0 %vm634_vm0, %v2013_v34 }
 0x432   : > { %4415 = vmatprep.mubr.msk.f32.mxu0 %vm634_vm0, %v2014_v59 }
 0x435   : > { %4416 = vmatmul.mubr.msk.f32.gmra.mxu0 %vm634_vm0, %v2015_v50 }
 0x436   : > { %4418 = vmatprep.mubr.msk.f32.mxu0 %vm634_vm0, %v2016_v26 }
 0x439   : > { %4419 = vmatmul.mubr.msk.f32.gmra.mxu0 %vm634_vm0, %v2017_v42 }
 0x43a   : > { %4421 = vmatprep.mubr.msk.f32.mxu0 %vm634_vm0, %v2018_v56 }
 0x43d   : > { %4422 = vmatmul.mubr.msk.f32.gmra.mxu0 %vm634_vm0, %v2019_v62 }
 0x43e   : > { %4424 = vmatprep.mubr.msk.f32.mxu0 %vm634_vm0, %v2020_v16 }
 0x441   : > { %4425 = vmatmul.mubr.msk.f32.gmra.mxu0 %vm634_vm0, %v2021_v1 }
 0x442   : > { %4427 = vmatprep.mubr.msk.f32.mxu0 %vm634_vm0, %v2022_v31 }
 0x445   : > { %4428 = vmatmul.mubr.msk.f32.gmra.mxu0 %vm634_vm0, %v2023_v12 }
 0x446   : > { %4430 = vmatprep.mubr.msk.f32.mxu0 %vm634_vm0, %v2024_v57 }
 0x449   : > { %4431 = vmatmul.mubr.msk.f32.gmra.mxu0 %vm634_vm0, %v2025_v40 }
 0x44a   : > { %4433 = vmatprep.mubr.msk.f32.mxu0 %vm634_vm0, %v2026_v29 }
 0x44d   : > { %4434 = vmatmul.mubr.msk.f32.gmra.mxu0 %vm634_vm0, %v2027_v53 }
 0x44e   : > { %4436 = vmatprep.mubr.msk.f32.mxu0 %vm634_vm0, %v2028_v10 }
 0x451   : > { %4437 = vmatmul.mubr.msk.f32.gmra.mxu0 %vm634_vm0, %v2029_v55 }
 0x452   : > { %4439 = vmatprep.mubr.msk.f32.mxu0 %vm634_vm0, %v2030_v63 }
 0x455   : > { %4440 = vmatmul.mubr.msk.f32.gmra.mxu0 %vm634_vm0, %v2031_v11 }
 0x4a1   : > { %v2198_v35 = vpop.f32.mrf.mxu0 }
 0x4a2   : > { %v2777_v45 = vsel %vm2776_vm4, %v2198_v35, -inf }
 0x4a3   : > { %2778 = vmax.xlane.f32.xlu0 %v2777_v45  ;;  %v4326_v41 = vpop.f32.mrf.mxu0 }
 0x4b1   : > { %v2280_v25 = vpop.f32.mrf.mxu1 }
 0x4b2   : > { %v2780_v60 = vsel %vm2776_vm4, %v2280_v25, -inf }
 0x4b3   : > { %2781 = vmax.xlane.f32.xlu1 %v2780_v60  ;;  %v4335_v34 = vpop.f32.mrf.mxu1 }
 0x4b9   : > { %v2362_v27 = vpop.f32.mrf.mxu0 }
 0x4ba   : > { %v2783_v47 = vsel %vm2776_vm4, %v2362_v27, -inf }
 0x4bb   : > { %2784 = vmax.xlane.f32.xlu0 %v2783_v47  ;;  %v4344_v5 = vpop.f32.mrf.mxu0 }
 0x4c1   : > { %v2444_v54 = vpop.f32.mrf.mxu1 }
 0x4c2   : > { %v2786_v26 = vsel %vm2776_vm4, %v2444_v54, -inf }
 0x4c3   : > { %2787 = vmax.xlane.f32.xlu1 %v2786_v26  ;;  %v4353_v32 = vpop.f32.mrf.mxu1 }
 0x4c9   : > { %v2526_v15 = vpop.f32.mrf.mxu0 }
 0x4ca   : > { %v2789_v17 = vsel %vm2776_vm4, %v2526_v15, -inf }
 0x4cb   : > { %2790 = vmax.xlane.f32.xlu0 %v2789_v17  ;;  %v4362_v50 = vpop.f32.mrf.mxu0 }
 0x4d1   : > { %v2608_v58 = vpop.f32.mrf.mxu1 }
 0x4d2   : > { %v2792_v62 = vsel %vm2776_vm4, %v2608_v58, -inf }
 0x4d3   : > { %2793 = vmax.xlane.f32.xlu1 %v2792_v62  ;;  %v4371_v59 = vpop.f32.mrf.mxu1 }
 0x4d9   : > { %v2690_v4 = vpop.f32.mrf.mxu0 }
 0x4da   : > { %v2795_v19 = vsel %vm2776_vm4, %v2690_v4, -inf }
 0x4db   : > { %2796 = vmax.xlane.f32.xlu0 %v2795_v19  ;;  %v4380_v56 = vpop.f32.mrf.mxu0 }
 0x4dd   : > { %v2772_v7 = vpop.f32.mrf.mxu1 }
 0x4de   : > { %v2798_v31 = vsel %vm2776_vm4, %v2772_v7, -inf }
 0x4df   : > { %2799 = vmax.xlane.f32.xlu1 %v2798_v31  ;;  %v4389_v42 = vpop.f32.mrf.mxu1 }
 0x4e9   : > { %v4408_v37 = vpop.f32.mrf.mxu0 }
 0x4eb   : > { %v2939_v20 = vpop.f32.mrf.mxu0 }
 0x4ed   : > { %v5939_v1 = vpop.f32.mrf.mxu0 }
 0x4ef   : > { %v2949_v0 = vpop.f32.mrf.mxu0 }
 0x4f0   : > { %4443 = vmatpush3.msra.mxu1 %v2949_v0 }
 0x4f1   : > { %4444 = vmatprep.subr.mxu1 %v4922_v46  ;;  %v4414_v34 = vpop.f32.mrf.mxu0 }
 0x4f2   : > { %4445 = vmatpush3.msra.mxu1 %v4408_v37 }
 0x4f3   : > { %4446 = vmatprep.subr.mxu1 %v4922_v46  ;;  %v2959_v47 = vpop.f32.mrf.mxu0 }
 0x4f4   : > { %4447 = vmatpush3.msra.mxu1 %v2939_v20 }
 0x4f5   : > { %4451 = vmatprep.subr.mxu1 %v4922_v46  ;;  %v4417_v5 = vpop.f32.mrf.mxu0 }
 0x52c   : > { %v2779_v40 = vpop.xlane.xlu0 %2778 }
 0x52d   : > { %v2801_v16 = vsub.f32 %v2198_v35, %v2779_v40 }
 0x52f   : > { %v2809_v49 = vmul.f32 1.442695, %v2801_v16 }
 0x531   : > { %4671 = vpow2.f32 %v2809_v49 }
 0x53c   : > { %v2782_v61 = vpop.xlane.xlu1 %2781 }
 0x53d   : > { %v2802_v57 = vsub.f32 %v2280_v25, %v2782_v61 }
 0x53e   : > { %v4672_v21 = vpop.eup %4671 }
 0x53f   : > { %v2811_v10 = vmul.f32 1.442695, %v2802_v57  ;;  %v2825_v12 = vsel %vm2776_vm4, %v4672_v21, 0.0 }
 0x540   : > { %2826 = vadd.xlane.f32.xlu0 %v2825_v12 }
 0x541   : > { %4673 = vpow2.f32 %v2811_v10 }
 0x544   : > { %v2785_v14 = vpop.xlane.xlu0 %2784 }
 0x545   : > { %v2803_v43 = vsub.f32 %v2362_v27, %v2785_v14 }
 0x547   : > { %v2813_v38 = vmul.f32 1.442695, %v2803_v43 }
 0x549   : > { %4675 = vpow2.f32 %v2813_v38 }
 0x54c   : > { %v2788_v8 = vpop.xlane.xlu1 %2787 }
 0x54d   : > { %v2804_v39 = vsub.f32 %v2444_v54, %v2788_v8  ;;  %v2969_v54 = vpop.f32.mrf.mxu0 }
 0x54e   : > { %v5945_v3 = vpop.eup %4673 }
 0x54f   : > { %v2815_v11 = vmul.f32 1.442695, %v2804_v39  ;;  %v2828_v30 = vsel %vm2776_vm4, %v5945_v3, 0.0  ;;  %v4420_v26 = vpop.f32.mrf.mxu0 }
 0x550   : > { %2829 = vadd.xlane.f32.xlu1 %v2828_v30 }
 0x551   : > { %4677 = vpow2.f32 %v2815_v11  ;;  %v2979_v50 = vpop.f32.mrf.mxu0 }
 0x554   : > { %v2791_v28 = vpop.xlane.xlu0 %2790 }
 0x555   : > { %v2805_v53 = vsub.f32 %v2526_v15, %v2791_v28 }
 0x556   : > { %v5949_v33 = vpop.eup %4675 }
 0x557   : > { %v2817_v23 = vmul.f32 1.442695, %v2805_v53  ;;  %v2831_v51 = vsel %vm2776_vm4, %v5949_v33, 0.0 }
 0x558   : > { %2832 = vadd.xlane.f32.xlu0 %v2831_v51 }
 0x559   : > { %4679 = vpow2.f32 %v2817_v23 }
 0x55c   : > { %v2794_v29 = vpop.xlane.xlu1 %2793 }
 0x55d   : > { %v2806_v63 = vsub.f32 %v2608_v58, %v2794_v29  ;;  %v4423_v58 = vpop.f32.mrf.mxu0  ;;  %v3058_v29 = vld [vmem:[%s6094_s7] sm:$0x1] }
 0x55e   : > { %v5953_v48 = vpop.eup %4677 }
 0x55f   : > { %v2819_v22 = vmul.f32 1.442695, %v2806_v63  ;;  %v2834_v6 = vsel %vm2776_vm4, %v5953_v48, 0.0  ;;  %v2989_v59 = vpop.f32.mrf.mxu0 }
 0x560   : > { %2835 = vadd.xlane.f32.xlu1 %v2834_v6 }
 0x561   : > { %4681 = vpow2.f32 %v2819_v22 }
 0x564   : > { %v2797_v55 = vpop.xlane.xlu0 %2796 }
 0x565   : > { %v2807_v44 = vsub.f32 %v2690_v4, %v2797_v55  ;;  %v4426_v4 = vpop.f32.mrf.mxu0 }
 0x566   : > { %v5957_v13 = vpop.eup %4679 }
 0x567   : > { %v2821_v2 = vmul.f32 1.442695, %v2807_v44  ;;  %v2837_v18 = vsel %vm2776_vm4, %v5957_v13, 0.0  ;;  %v2999_v31 = vpop.f32.mrf.mxu0 }
 0x568   : > { %2838 = vadd.xlane.f32.xlu0 %v2837_v18  ;;  %v2800_v9 = vpop.xlane.xlu1 %2799 }
 0x569   : > { %4683 = vpow2.f32 %v2821_v2  ;;  %v2808_v36 = vsub.f32 %v2772_v7, %v2800_v9  ;;  %v4429_v42 = vpop.f32.mrf.mxu0 }
 0x56b   : > { %v2823_v52 = vmul.f32 1.442695, %v2808_v36  ;;  %v3009_v0 = vpop.f32.mrf.mxu0 }
 0x56d   : > { %4685 = vpow2.f32 %v2823_v52  ;;  %v4432_v40 = vpop.f32.mrf.mxu0 }
 0x56e   : > { %v5961_v24 = vpop.eup %4681 }
 0x56f   : > { %v2840_v35 = vsel %vm2776_vm4, %v5961_v24, 0.0  ;;  %v3019_v57 = vpop.f32.mrf.mxu0 }
 0x570   : > { %2841 = vadd.xlane.f32.xlu1 %v2840_v35 }
 0x576   : > { %v5965_v45 = vpop.eup %4683 }
 0x577   : > { %v2843_v41 = vsel %vm2776_vm4, %v5965_v45, 0.0 }
 0x578   : > { %2844 = vadd.xlane.f32.xlu0 %v2843_v41 }
 0x57a   : > { %v5969_v25 = vpop.eup %4685 }
 0x57b   : > { %v2846_v60 = vsel %vm2776_vm4, %v5969_v25, 0.0 }
 0x57c   : > { %2847 = vadd.xlane.f32.xlu1 %v2846_v60 }
 0x5c9   : > { %v2827_v27 = vpop.xlane.xlu0 %2826 }
 0x5ca   : > { %4687 = vrcp.f32 %v2827_v27 }
 0x5d7   : > { %v4688_v32 = vpop.eup %4687 }
 0x5d8   : > { %v2857_v15 = vmul.f32 %v4688_v32, %v4672_v21  ;;  %v4435_v21 = vpop.f32.mrf.mxu0 }
 0x5d9   : > { %v2830_v17 = vpop.xlane.xlu1 %2829 }
 0x5da   : > { %4689 = vrcp.f32 %v2830_v17  ;;  %4449 = vmatmul.mubr.msk.f32.vlgmr.msra.gmra.mxu1 %vm461_vm1, %v2857_v15  ;;  %v3029_v43 = vpop.f32.mrf.mxu0 }
 0x5db   : > { %4452 = vmatpush3.msra.mxu1 %v4414_v34  ;;  %4457 = vmatprep.mubr.msk.f32.mxu1 %vm4923_vm3, %v4922_v46 }
 0x5dc   : > { %4453 = vmatprep.subr.mxu1 %v4922_v46  ;;  %v4438_v8 = vpop.f32.mrf.mxu0 }
 0x5dd   : > { %4454 = vmatpush3.msra.mxu1 %v2959_v47 }
 0x5de   : > { %4455 = vmatprep.subr.mxu1 %v4922_v46  ;;  %v3039_v11 = vpop.f32.mrf.mxu0 }
 0x5df   : > { %4456 = vmatpush3.msra.mxu1 %v5939_v1 }
 0x5e0   : > { %4460 = vmatprep.subr.mxu1 %v4922_v46  ;;  %v4441_v28 = vpop.f32.mrf.mxu0 }
 0x5e1   : > { %v2833_v62 = vpop.xlane.xlu0 %2832 }
 0x5e2   : > { %4691 = vrcp.f32 %v2833_v62  ;;  %v3049_v23 = vpop.f32.mrf.mxu0 }
 0x5e7   : > { %v4690_v19 = vpop.eup %4689 }
 0x5e8   : > { %v2858_v56 = vmul.f32 %v4690_v19, %v5945_v3 }
 0x5e9   : > { %v2836_v7 = vpop.xlane.xlu1 %2835 }
 0x5ea   : > { %4693 = vrcp.f32 %v2836_v7  ;;  %4458 = vmatmul.mubr.msk.f32.vlgmr.msra.gmra.mxu1 %vm461_vm1, %v2858_v56 }
 0x5eb   : > { %4461 = vmatpush3.msra.mxu1 %v2979_v50  ;;  %4466 = vmatprep.mubr.msk.f32.mxu1 %vm4923_vm3, %v4922_v46 }
 0x5ec   : > { %4462 = vmatprep.subr.mxu1 %v4922_v46 }
 0x5ed   : > { %4463 = vmatpush3.msra.mxu1 %v4417_v5 }
 0x5ee   : > { %4464 = vmatprep.subr.mxu1 %v4922_v46 }
 0x5ef   : > { %v4692_v37 = vpop.eup %4691  ;;  %4465 = vmatpush3.msra.mxu1 %v2969_v54 }
 0x5f0   : > { %4469 = vmatprep.subr.mxu1 %v4922_v46  ;;  %v2859_v20 = vmul.f32 %v4692_v37, %v5949_v33 }
 0x5f1   : > { %v2839_v1 = vpop.xlane.xlu0 %2838 }
 0x5f2   : > { %4695 = vrcp.f32 %v2839_v1  ;;  %4467 = vmatmul.mubr.msk.f32.vlgmr.msra.gmra.mxu1 %vm461_vm1, %v2859_v20 }
 0x5f3   : > { %4470 = vmatpush3.msra.mxu1 %v4423_v58  ;;  %4475 = vmatprep.mubr.msk.f32.mxu1 %vm4923_vm3, %v4922_v46 }
 0x5f4   : > { %4471 = vmatprep.subr.mxu1 %v4922_v46 }
 0x5f5   : > { %4472 = vmatpush3.msra.mxu1 %v2989_v59 }
 0x5f6   : > { %4473 = vmatprep.subr.mxu1 %v4922_v46 }
 0x5f7   : > { %v4694_v16 = vpop.eup %4693  ;;  %4474 = vmatpush3.msra.mxu1 %v4420_v26 }
 0x5f8   : > { %4478 = vmatprep.subr.mxu1 %v4922_v46  ;;  %v2860_v49 = vmul.f32 %v4694_v16, %v5953_v48 }
 0x5f9   : > { %v2842_v61 = vpop.xlane.xlu1 %2841 }
 0x5fa   : > { %4697 = vrcp.f32 %v2842_v61  ;;  %4476 = vmatmul.mubr.msk.f32.vlgmr.msra.gmra.mxu1 %vm461_vm1, %v2860_v49 }
 0x5fb   : > { %4479 = vmatpush3.msra.mxu1 %v3009_v0  ;;  %4484 = vmatprep.mubr.msk.f32.mxu1 %vm4923_vm3, %v4922_v46 }
 0x5fc   : > { %4480 = vmatprep.subr.mxu1 %v4922_v46 }
 0x5fd   : > { %4481 = vmatpush3.msra.mxu1 %v4426_v4 }
 0x5fe   : > { %4482 = vmatprep.subr.mxu1 %v4922_v46 }
 0x5ff   : > { %v4696_v10 = vpop.eup %4695  ;;  %4483 = vmatpush3.msra.mxu1 %v2999_v31 }
 0x600   : > { %4487 = vmatprep.subr.mxu1 %v4922_v46  ;;  %v2861_v12 = vmul.f32 %v4696_v10, %v5957_v13 }
 0x601   : > { %v2845_v14 = vpop.xlane.xlu0 %2844 }
 0x602   : > { %4699 = vrcp.f32 %v2845_v14  ;;  %4485 = vmatmul.mubr.msk.f32.vlgmr.msra.gmra.mxu1 %vm461_vm1, %v2861_v12 }
 0x603   : > { %4488 = vmatpush3.msra.mxu1 %v4432_v40  ;;  %4493 = vmatprep.mubr.msk.f32.mxu1 %vm4923_vm3, %v4922_v46 }
 0x604   : > { %4489 = vmatprep.subr.mxu1 %v4922_v46 }
 0x605   : > { %4490 = vmatpush3.msra.mxu1 %v3019_v57  ;;  %v2848_v38 = vpop.xlane.xlu1 %2847 }
 0x606   : > { %4491 = vmatprep.subr.mxu1 %v4922_v46  ;;  %4701 = vrcp.f32 %v2848_v38 }
 0x607   : > { %v4698_v39 = vpop.eup %4697  ;;  %4492 = vmatpush3.msra.mxu1 %v4429_v42 }
 0x608   : > { %4496 = vmatprep.subr.mxu1 %v4922_v46  ;;  %v2862_v3 = vmul.f32 %v4698_v39, %v5961_v24 }
 0x60a   : > { %4494 = vmatmul.mubr.msk.f32.vlgmr.msra.gmra.mxu1 %vm461_vm1, %v2862_v3 }
 0x60b   : > { %4497 = vmatpush3.msra.mxu1 %v3039_v11  ;;  %4502 = vmatprep.mubr.msk.f32.mxu1 %vm4923_vm3, %v4922_v46 }
 0x60c   : > { %4498 = vmatprep.subr.mxu1 %v4922_v46 }
 0x60d   : > { %4499 = vmatpush3.msra.mxu1 %v4435_v21 }
 0x60e   : > { %4500 = vmatprep.subr.mxu1 %v4922_v46 }
 0x60f   : > { %v4700_v30 = vpop.eup %4699  ;;  %4501 = vmatpush3.msra.mxu1 %v3029_v43 }
 0x610   : > { %4505 = vmatprep.subr.mxu1 %v4922_v46  ;;  %v2863_v53 = vmul.f32 %v4700_v30, %v5965_v45 }
 0x612   : > { %4503 = vmatmul.mubr.msk.f32.vlgmr.msra.gmra.mxu1 %vm461_vm1, %v2863_v53 }
 0x613   : > { %v4702_v33 = vpop.eup %4701  ;;  %4506 = vmatpush3.msra.mxu1 %v4441_v28  ;;  %4511 = vmatprep.mubr.msk.f32.mxu1 %vm4923_vm3, %v4922_v46 }
 0x614   : > { %4507 = vmatprep.subr.mxu1 %v4922_v46  ;;  %v2864_v51 = vmul.f32 %v4702_v33, %v5969_v25 }
 0x615   : > { %4508 = vmatpush3.msra.mxu1 %v3049_v23 }
 0x616   : > { %4509 = vmatprep.subr.mxu1 %v4922_v46 }
 0x617   : > { %4510 = vmatpush3.msra.mxu1 %v4438_v8 }
 0x618   : > { %4512 = vmatmul.mubr.msk.f32.vlgmr.msra.gmra.mxu1 %vm461_vm1, %v2864_v51 }
 0x69a   : > { %v3128_v63 = vpop.f32.mrf.mxu1 }
 0x69b   : > { %v3129_v48 = vadd.f32 %v3128_v63, %v3058_v29 }
 0x69c   : > { %v4450_v22 = vpop.f32.mrf.mxu1 }
 0x69d   : > { %3643 = vst [vmem:[%s6027_s0] sm:$0x1] %v3129_v48 }
 0x6aa   : > { %v3201_v46 = vpop.f32.mrf.mxu1 }
 0x6ab   : > { %v3202_v6 = vadd.f32 %v3201_v46, %v3058_v29 }
 0x6ac   : > { %v4459_v55 = vpop.f32.mrf.mxu1 }
 0x6ad   : > { %3644 = vst [vmem:[%s6027_s0 + $0x1] sm:$0x1] %v3202_v6 }
 0x6b2   : > { %v3274_v44 = vpop.f32.mrf.mxu1 }
 0x6b3   : > { %v3275_v13 = vadd.f32 %v3274_v44, %v3058_v29 }
 0x6b4   : > { %v4468_v2 = vpop.f32.mrf.mxu1 }
 0x6b5   : > { %3645 = vst [vmem:[%s6027_s0 + $0x2] sm:$0x1] %v3275_v13 }
 0x6ba   : > { %v3347_v18 = vpop.f32.mrf.mxu1 }
 0x6bb   : > { %v3348_v9 = vadd.f32 %v3347_v18, %v3058_v29 }
 0x6bc   : > { %v4477_v36 = vpop.f32.mrf.mxu1 }
 0x6bd   : > { %3646 = vst [vmem:[%s6027_s0 + $0x3] sm:$0x1] %v3348_v9 }
 0x6c2   : > { %v3420_v52 = vpop.f32.mrf.mxu1 }
 0x6c3   : > { %v3421_v24 = vadd.f32 %v3420_v52, %v3058_v29 }
 0x6c4   : > { %v4486_v35 = vpop.f32.mrf.mxu1 }
 0x6c5   : > { %3647 = vst [vmem:[%s6027_s0 + $0x4] sm:$0x1] %v3421_v24 }
 0x6ca   : > { %v3493_v45 = vpop.f32.mrf.mxu1 }
 0x6cb   : > { %v3494_v41 = vadd.f32 %v3493_v45, %v3058_v29 }
 0x6cc   : > { %v4495_v25 = vpop.f32.mrf.mxu1 }
 0x6cd   : > { %3648 = vst [vmem:[%s6027_s0 + $0x5] sm:$0x1] %v3494_v41 }
 0x6d2   : > { %v3566_v60 = vpop.f32.mrf.mxu1 }
 0x6d3   : > { %v3567_v34 = vadd.f32 %v3566_v60, %v3058_v29 }
 0x6d4   : > { %v4504_v27 = vpop.f32.mrf.mxu1 }
 0x6d5   : > { %3649 = vst [vmem:[%s6027_s0 + $0x6] sm:$0x1] %v3567_v34 }
 0x6d8   : > { %v3639_v47 = vpop.f32.mrf.mxu1 }
 0x6d9   : > { %v3640_v5 = vadd.f32 %v3639_v47, %v3058_v29 }
 0x6da   : > { %v4513_v54 = vpop.f32.mrf.mxu1 }
 0x6db   : > { %3650 = vst [vmem:[%s6027_s0 + $0x7] sm:$0x1] %v3640_v5 }
 0x6dc   : > { %4850 = shalt.err (!%p4847_p6)
}
 0x6dd   : > { %s4851_s11 = scalar_lea.hbm %s6043_s23, 128  ;;  %s4855_s26 = scalar_lea.hbm %s6095_s8, 256 }
 0x6de   : > { %p4852_p7 = scmp.ne.s32.totalorder %s6043_s23, %s4851_s11  ;;  %p4856_p11 = scmp.lt.s32.totalorder %s6043_s23, %s6095_s8 }
 0x6df   : > { %p4857_p3 = scmp.lt.s32.totalorder %s4855_s26, %s4851_s11 }
 0x6e0   : > { %p4853_p5 = pnand %p4852_p7, %p6134_p13 }
 0x6e1   : > { %p4858_p12 = por %p4857_p3, %p4856_p11 }
 0x6e2   : > { %p4854_p8 = pneg %p4853_p5 }
 0x6e4   : > { %p4859_p9 = pnand %p4858_p12, %p4854_p8 }
 0x6e6   : > { %4862 = shalt.err (!%p4859_p9)
}
 0x6e7   : > { %s4925_s14 = smov 16   ;;  %s4926_s0 = smov 1  }
 0x6e8   : > { %4551 = dma.vmem_to_hbm [thread:$0]  (%p6134_p13), %s6038_s10, 128, %s6043_s23, %s3652_s17, %s4925_s14, %s4925_s14, %s4926_s0  }
 0x6e9 PF: > { %s3680_s20 = sand.u32 1, %s4901_s27   ;;  %p6135_p0 = scmp.ne.s32.totalorder %s6111_s12, 0 }
 0x6ea   : > { %p6136_p2 = scmp.ge.s32.totalorder %s4913_s30, 2  ;;  %s3681_s21 = scalar_lea.sflag [#allocation4], %s3680_s20 }
 0x6ec   : > { %p4571_p10 = pnand %p6136_p2, %p6135_p0 }
 0x6ee   : > { %p4572_p1 = pneg %p4571_p10 }
 0x6f0   : > { %4896 = dma.done.wait (%p4572_p1), %s3681_s21, 128  }
 0x6f1   : > { %4898 = vsyncadd (%p4572_p1), %s3681_s21, 4294967168  ;;  %s6137_s22 = sld [smem:[#allocation17_spill]]  ;;  %p25_p4 = scmp.ge.s32.totalorder %s5061_s16, 4  }
 0x6f2   : > { %s6138_s27 = smov %s4905_s28  ;;  %s6139_s28 = smov %s4909_s29 }
 0x6f3   : > { %s6141_s30 = smov %s5061_s16  ;;  %27 = sbr.rel (!%p25_p4) target bundleno = 13 (0xd), region = 122 }
 0x6f7   : > { %s6140_s29 = smov %s6137_s22 }
 0x6f8   :  { %3686 = vsyncpa [#allocation3], 1 }
 0x6f9   :  { %3688 = vsyncpa [#allocation3 + $0x1], 1 }
 0x6fa   :  { %3689 = vsyncpa [#allocation6], 1 }
 0x6fb   :  { %3691 = vsyncpa [#allocation6 + $0x1], 1 }
 0x6fc   :  { %3692 = vsyncpa [#allocation9], 1 }
 0x6fd   :  { %3693 = vsyncpa [#allocation4], 1 }
 0x6fe   :  { %3695 = vsyncpa [#allocation4 + $0x1], 1 }

</bundles_post_ra>
